<compile_context>
chip_gen: v5e
topology: v5e:2x2
jax: 0.10.0
libtpu: 0.0.40
codegen_flags: <defaults>
</compile_context>

<pallas_src>
import functools

import jax
import jax.numpy as jnp
from jax.experimental import pallas as pl
from jax.experimental.pallas import tpu as pltpu


# ----------------------------------------------------------------------------
# small helpers
# ----------------------------------------------------------------------------
def _tile_m(m, cap=512):
    """Row tile that divides M, is a multiple of 8, and fits VMEM easily."""
    if m <= cap:
        return m
    for t in (cap, 256, 128, 64, 32, 16, 8):
        if m % t == 0:
            return t
    return m  # fallback: single whole-slab block


def _score_tile(m, cap=512):
    """Tile for the scoring head: output block is (1, tile) so the tile must
    be a multiple of 128 (lane-dense) or equal to M."""
    if m <= cap:
        return m
    for t in (cap, 384, 256, 128):
        if m % t == 0:
            return t
    return m


def _layernorm(x, g, b, eps):
    mu = jnp.mean(x, axis=-1, keepdims=True)
    var = jnp.mean(jnp.square(x - mu), axis=-1, keepdims=True)
    return (x - mu) * jax.lax.rsqrt(var + eps) * g + b


# ----------------------------------------------------------------------------
# Pallas kernels
# ----------------------------------------------------------------------------
def _proj_ln_kernel(x_ref, w_ref, b_ref, g_ref, be_ref, o_ref, *, eps, mdt):
    """o = LayerNorm(x @ w + b)."""
    y = jnp.dot(x_ref[...].astype(mdt), w_ref[...].astype(mdt),
                preferred_element_type=jnp.float32) + b_ref[...]
    o_ref[...] = _layernorm(y, g_ref[...], be_ref[...], eps).astype(o_ref.dtype)


def _encoder_layer_kernel(x_ref,
                          wq_ref, bq_ref, wk_ref, bk_ref, wv_ref, bv_ref,
                          wo_ref, bo_ref, g1_ref, be1_ref,
                          w1_ref, b1_ref, w2_ref, b2_ref, g2_ref, be2_ref,
                          s_ref, o_ref, *, n_head, scale, eps, mdt):
    """One full post-LN encoder layer for one batch element.

    s = LN(MHA(x) @ Wo + bo + x)          (attention-sublayer output)
    o = LN(relu(s @ w1 + b1) @ w2 + b2 + s)
    """
    x_f32 = x_ref[0].astype(jnp.float32)          # (L, D) residual in f32
    x_m = x_ref[0].astype(mdt)                    # MXU input
    L = x_ref.shape[1]
    D = o_ref.shape[2]

    acc = jnp.zeros((L, D), jnp.float32)
    for h in range(n_head):  # static unroll; heads indexed on leading axis
        q = jnp.dot(x_m, wq_ref[h].astype(mdt),
                    preferred_element_type=jnp.float32) + bq_ref[h]
        k = jnp.dot(x_m, wk_ref[h].astype(mdt),
                    preferred_element_type=jnp.float32) + bk_ref[h]
        v = jnp.dot(x_m, wv_ref[h].astype(mdt),
                    preferred_element_type=jnp.float32) + bv_ref[h]
        # (L, L) scores: contract the d_k axis of q and k (no explicit k.T)
        sc = jax.lax.dot_general(q.astype(mdt), k.astype(mdt),
                                 (((1,), (1,)), ((), ())),
                                 preferred_element_type=jnp.float32) * scale
        m = jnp.max(sc, axis=-1, keepdims=True)
        e = jnp.exp(sc - m)
        p = e * pl.reciprocal(jnp.sum(e, axis=-1, keepdims=True), approx=True)
        oh = jnp.dot(p.astype(mdt), v.astype(mdt),
                     preferred_element_type=jnp.float32)
        # accumulate this head's Wo contribution (avoids lane-dim concat)
        acc = acc + jnp.dot(oh.astype(mdt), wo_ref[h].astype(mdt),
                            preferred_element_type=jnp.float32)

    y = acc + bo_ref[...] + x_f32
    s = _layernorm(y, g1_ref[...], be1_ref[...], eps)
    s_ref[0] = s.astype(s_ref.dtype)

    # TODO(synk): attention / FFN dropout (p=0.1) is identity in inference.
    h1 = jnp.dot(s.astype(mdt), w1_ref[...].astype(mdt),
                 preferred_element_type=jnp.float32) + b1_ref[...]
    h1 = jnp.maximum(h1, 0.0)
    y2 = jnp.dot(h1.astype(mdt), w2_ref[...].astype(mdt),
                 preferred_element_type=jnp.float32) + b2_ref[...]
    y2 = y2 + s
    o_ref[0] = _layernorm(y2, g2_ref[...], be2_ref[...], eps).astype(o_ref.dtype)


def _score_kernel(s_ref, w1_ref, b1_ref, g_ref, be_ref, w2t_ref, b2_ref, o_ref,
                  *, use_ln, eps, mdt):
    """Scoring head: sigmoid((relu(s @ w1 + b1) [LN]) @ w2 + b2), written as a
    lane-dense (1, TILE_M) row instead of a lane-width-1 (TILE_M, 1) column."""
    h = jnp.dot(s_ref[...].astype(mdt), w1_ref[...].astype(mdt),
                preferred_element_type=jnp.float32) + b1_ref[...]
    h = jnp.maximum(h, 0.0)
    # TODO(synk): dropout (p=0.5) would go here in training mode; identity now.
    if use_ln:
        h = _layernorm(h, g_ref[...], be_ref[...], eps)
    y = jax.lax.dot_general(w2t_ref[...].astype(mdt), h.astype(mdt),
                            (((1,), (1,)), ((), ())),
                            preferred_element_type=jnp.float32) + b2_ref[...]
    o_ref[...] = jax.nn.sigmoid(y).astype(o_ref.dtype)


# ----------------------------------------------------------------------------
# pallas_call wrappers
# ----------------------------------------------------------------------------
_PARALLEL_1D = pltpu.CompilerParams(dimension_semantics=("parallel",),
                                    vmem_limit_bytes=64 * 1024 * 1024)


def proj_layernorm(x, w, b, g, beta, *, eps=1e-6, mdt=jnp.bfloat16):
    M, K = x.shape
    N = w.shape[1]
    tm = _tile_m(M)
    return pl.pallas_call(
        functools.partial(_proj_ln_kernel, eps=eps, mdt=mdt),
        out_shape=jax.ShapeDtypeStruct((M, N), jnp.float32),
        grid=(M // tm,),
        in_specs=[
            pl.BlockSpec((tm, K), lambda i: (i, 0)),
            pl.BlockSpec((K, N), lambda i: (0, 0)),   # resident weight
            pl.BlockSpec((1, N), lambda i: (0, 0)),
            pl.BlockSpec((1, N), lambda i: (0, 0)),
            pl.BlockSpec((1, N), lambda i: (0, 0)),
        ],
        out_specs=pl.BlockSpec((tm, N), lambda i: (i, 0)),
        compiler_params=_PARALLEL_1D,
    )(x, w, b.reshape(1, N), g.reshape(1, N), beta.reshape(1, N))


def encoder_layer(h, lp, *, n_head, d_k, d_v, eps=1e-6, mdt=jnp.bfloat16):
    """Fused attention + FFN encoder layer, grid over batch elements."""
    B, L, D = h.shape
    Di = lp["w1"].shape[1]
    scale = 1.0 / float(d_k) ** 0.5

    def const3(b):
        return (0, 0, 0)

    def const2(b):
        return (0, 0)

    s, o = pl.pallas_call(
        functools.partial(_encoder_layer_kernel, n_head=n_head, scale=scale,
                          eps=eps, mdt=mdt),
        out_shape=(jax.ShapeDtypeStruct((B, L, D), jnp.float32),
                   jax.ShapeDtypeStruct((B, L, D), jnp.float32)),
        grid=(B,),
        in_specs=[
            pl.BlockSpec((1, L, D), lambda b: (b, 0, 0)),          # x
            pl.BlockSpec((n_head, D, d_k), const3),                # wq
            pl.BlockSpec((n_head, 1, d_k), const3),                # bq
            pl.BlockSpec((n_head, D, d_k), const3),                # wk
            pl.BlockSpec((n_head, 1, d_k), const3),                # bk
            pl.BlockSpec((n_head, D, d_v), const3),                # wv
            pl.BlockSpec((n_head, 1, d_v), const3),                # bv
            pl.BlockSpec((n_head, d_v, D), const3),                # wo
            pl.BlockSpec((1, D), const2),                          # bo
            pl.BlockSpec((1, D), const2),                          # ln1 gamma
            pl.BlockSpec((1, D), const2),                          # ln1 beta
            pl.BlockSpec((D, Di), const2),                         # w1
            pl.BlockSpec((1, Di), const2),                         # b1
            pl.BlockSpec((Di, D), const2),                         # w2
            pl.BlockSpec((1, D), const2),                          # b2
            pl.BlockSpec((1, D), const2),                          # ln2 gamma
            pl.BlockSpec((1, D), const2),                          # ln2 beta
        ],
        out_specs=(pl.BlockSpec((1, L, D), lambda b: (b, 0, 0)),
                   pl.BlockSpec((1, L, D), lambda b: (b, 0, 0))),
        compiler_params=_PARALLEL_1D,
    )(h,
      lp["wq"], lp["bq"], lp["wk"], lp["bk"], lp["wv"], lp["bv"],
      lp["wo"], lp["bo"].reshape(1, D),
      lp["ln1_g"].reshape(1, D), lp["ln1_b"].reshape(1, D),
      lp["w1"], lp["b1"].reshape(1, Di), lp["w2"], lp["b2"].reshape(1, D),
      lp["ln2_g"].reshape(1, D), lp["ln2_b"].reshape(1, D))
    return s, o


def score_head(s, w1, b1, g, beta, w2, b2, *, use_ln, eps=1e-6,
               mdt=jnp.bfloat16):
    M, D = s.shape
    tm = _score_tile(M)
    w2t = w2.reshape(D, 1).T            # (1, D) row vector
    out = pl.pallas_call(
        functools.partial(_score_kernel, use_ln=use_ln, eps=eps, mdt=mdt),
        out_shape=jax.ShapeDtypeStruct((1, M), jnp.float32),  # lane-dense
        grid=(M // tm,),
        in_specs=[
            pl.BlockSpec((tm, D), lambda i: (i, 0)),
            pl.BlockSpec((D, D), lambda i: (0, 0)),   # resident l1 weight
            pl.BlockSpec((1, D), lambda i: (0, 0)),
            pl.BlockSpec((1, D), lambda i: (0, 0)),
            pl.BlockSpec((1, D), lambda i: (0, 0)),
            pl.BlockSpec((1, D), lambda i: (0, 0)),
            pl.BlockSpec((1, 1), lambda i: (0, 0)),
        ],
        out_specs=pl.BlockSpec((1, tm), lambda i: (0, i)),
        compiler_params=_PARALLEL_1D,
    )(s, w1, b1.reshape(1, D), g.reshape(1, D), beta.reshape(1, D),
      w2t, b2.reshape(1, 1))
    return out


# ----------------------------------------------------------------------------
# Model forward (glue in plain JAX — only free reshapes between kernels)
# ----------------------------------------------------------------------------
def sum_cap_encoder_forward(params, src_seq, *, n_head, d_k, d_v,
                            use_drop_out=False, use_layer_norm=False,
                            matmul_dtype=jnp.bfloat16):
    """src_seq: (B, L, d_inp) -> (enc_output (B, L, d_model), scores (B, L))."""
    del use_drop_out  # TODO(synk): dropout is identity in inference mode
    B, L, d_inp = src_seq.shape
    M = B * L
    x = src_seq.reshape(M, d_inp)

    # proj + layer_norm (fused)
    h2d = proj_layernorm(x, params["proj_w"], params["proj_b"],
                         params["ln_g"], params["ln_b"], mdt=matmul_dtype)
    d_model = h2d.shape[1]
    h = h2d.reshape(B, L, d_model)

    s = None
    for lp in params["layers"]:
        # fully fused encoder layer: QKV + attention + Wo + res + LN + FFN + res + LN
        s, h = encoder_layer(h, lp, n_head=n_head, d_k=d_k, d_v=d_v,
                             mdt=matmul_dtype)

    # fused scoring head: l1 + relu (+ LN) + l2 + sigmoid, lane-dense output
    scores = score_head(s.reshape(M, d_model),
                        params["l1_w"], params["l1_b"],
                        params["norm_lin_g"], params["norm_lin_b"],
                        params["l2_w"], params["l2_b"],
                        use_ln=use_layer_norm, mdt=matmul_dtype)
    return h, scores.reshape(B, L)


def init_params(key, d_inp, d_model, d_inner, n_head, d_k, d_v, n_layers):
    keys = iter(jax.random.split(key, 8 + 6 * n_layers))

    def dense(din, dout):
        w = 0.02 * jax.random.normal(next(keys), (din, dout), jnp.float32)
        b = jnp.zeros((dout,), jnp.float32)
        return w, b

    p = {}
    p["proj_w"], p["proj_b"] = dense(d_inp, d_model)
    p["ln_g"] = jnp.ones((d_model,), jnp.float32)
    p["ln_b"] = jnp.zeros((d_model,), jnp.float32)
    p["l1_w"], p["l1_b"] = dense(d_inp, d_inp)
    p["l2_w"], p["l2_b"] = dense(d_inp, 1)
    p["norm_lin_g"] = jnp.ones((d_inp,), jnp.float32)
    p["norm_lin_b"] = jnp.zeros((d_inp,), jnp.float32)

    layers = []
    for _ in range(n_layers):
        lp = {}
        wq, bq = dense(d_model, n_head * d_k)
        wk, bk = dense(d_model, n_head * d_k)
        wv, bv = dense(d_model, n_head * d_v)
        wo, bo = dense(n_head * d_v, d_model)
        # per-head layout: heads on the leading (free-to-index) axis
        lp["wq"] = wq.reshape(d_model, n_head, d_k).transpose(1, 0, 2)
        lp["bq"] = bq.reshape(n_head, 1, d_k)
        lp["wk"] = wk.reshape(d_model, n_head, d_k).transpose(1, 0, 2)
        lp["bk"] = bk.reshape(n_head, 1, d_k)
        lp["wv"] = wv.reshape(d_model, n_head, d_v).transpose(1, 0, 2)
        lp["bv"] = bv.reshape(n_head, 1, d_v)
        lp["wo"] = wo.reshape(n_head, d_v, d_model)
        lp["bo"] = bo
        lp["ln1_g"] = jnp.ones((d_model,), jnp.float32)
        lp["ln1_b"] = jnp.zeros((d_model,), jnp.float32)
        lp["w1"], lp["b1"] = dense(d_model, d_inner)
        lp["w2"], lp["b2"] = dense(d_inner, d_model)
        lp["ln2_g"] = jnp.ones((d_model,), jnp.float32)
        lp["ln2_b"] = jnp.zeros((d_model,), jnp.float32)
        layers.append(lp)
    p["layers"] = layers
    return p


if __name__ == "__main__":
    # Small config consistent with the module (d_inp == d_model, see note above).
    B, L = 2, 8
    d_inp = 32
    d_model = 32
    d_inner = 64
    n_head = 2
    d_k = 16
    d_v = 16
    n_layers = 2

    key = jax.random.PRNGKey(0)
    pkey, xkey = jax.random.split(key)
    params = init_params(pkey, d_inp, d_model, d_inner, n_head, d_k, d_v,
                         n_layers)
    src_seq = jax.random.normal(xkey, (B, L, d_inp), jnp.float32)

    fwd = jax.jit(functools.partial(
        sum_cap_encoder_forward, n_head=n_head, d_k=d_k, d_v=d_v,
        use_drop_out=False, use_layer_norm=False,
        matmul_dtype=jnp.bfloat16))   # bf16 MXU inputs, f32 accumulate

    enc_output, scores = fwd(params, src_seq)
    jax.block_until_ready((enc_output, scores))

    assert enc_output.shape == (B, L, d_model), enc_output.shape
    assert scores.shape == (B, L), scores.shape
    assert bool(jnp.all(jnp.isfinite(enc_output)))
    assert bool(jnp.all(jnp.isfinite(scores)))
    assert bool(jnp.all((scores >= 0.0) & (scores <= 1.0)))
    print("KERNEL_OK")
</pallas_src>

<mosaic_0001>
module attributes {stable_mosaic.version = 11 : i64} {
  func.func @_proj_ln_kernel(%arg0: i32, %arg1: memref<16x32xf32, #tpu.memory_space<vmem>>, %arg2: memref<32x32xf32, #tpu.memory_space<vmem>>, %arg3: memref<1x32xf32, #tpu.memory_space<vmem>>, %arg4: memref<1x32xf32, #tpu.memory_space<vmem>>, %arg5: memref<1x32xf32, #tpu.memory_space<vmem>>, %arg6: memref<16x32xf32, #tpu.memory_space<vmem>>) attributes {dimension_semantics = [#tpu.dimension_semantics<parallel>], iteration_bounds = array<i64: 1>, scalar_prefetch = 0 : i64, scratch_operands = 0 : i64, tpu.core_type = #tpu.core_type<tc>, window_params = [{transform_indices = @transform_0, window_bounds = array<i64: 16, 32>}, {pipeline_mode = #tpu.pipeline_mode<synchronous>, transform_indices = @transform_1, window_bounds = array<i64: 32, 32>}, {pipeline_mode = #tpu.pipeline_mode<synchronous>, transform_indices = @transform_2, window_bounds = array<i64: 1, 32>}, {pipeline_mode = #tpu.pipeline_mode<synchronous>, transform_indices = @transform_3, window_bounds = array<i64: 1, 32>}, {pipeline_mode = #tpu.pipeline_mode<synchronous>, transform_indices = @transform_4, window_bounds = array<i64: 1, 32>}, {transform_indices = @transform_5, window_bounds = array<i64: 16, 32>}]} {
    %c0 = arith.constant 0 : index
    %c0_0 = arith.constant 0 : index
    %0 = vector.load %arg1[%c0, %c0_0] : memref<16x32xf32, #tpu.memory_space<vmem>>, vector<16x32xf32>
    %1 = arith.truncf %0 : vector<16x32xf32> to vector<16x32xbf16>
    %c0_1 = arith.constant 0 : index
    %c0_2 = arith.constant 0 : index
    %2 = vector.load %arg2[%c0_1, %c0_2] : memref<32x32xf32, #tpu.memory_space<vmem>>, vector<32x32xf32>
    %3 = arith.truncf %2 : vector<32x32xf32> to vector<32x32xbf16>
    %cst = arith.constant dense<0.000000e+00> : vector<16x32xf32>
    %4 = tpu.matmul %1, %3, %cst {dimension_numbers = #tpu.dot_dimension_numbers<[1], [0], [0], [1], [0, 0, 1, 1], [], []>} : vector<16x32xbf16>, vector<32x32xbf16>, vector<16x32xf32> -> vector<16x32xf32>
    %c0_3 = arith.constant 0 : index
    %c0_4 = arith.constant 0 : index
    %5 = vector.load %arg3[%c0_3, %c0_4] : memref<1x32xf32, #tpu.memory_space<vmem>>, vector<1x32xf32>
    %6 = vector.broadcast %5 : vector<1x32xf32> to vector<16x32xf32>
    %7 = arith.addf %4, %6 : vector<16x32xf32>
    %c0_5 = arith.constant 0 : index
    %c0_6 = arith.constant 0 : index
    %8 = vector.load %arg4[%c0_5, %c0_6] : memref<1x32xf32, #tpu.memory_space<vmem>>, vector<1x32xf32>
    %c0_7 = arith.constant 0 : index
    %c0_8 = arith.constant 0 : index
    %9 = vector.load %arg5[%c0_7, %c0_8] : memref<1x32xf32, #tpu.memory_space<vmem>>, vector<1x32xf32>
    %cst_9 = arith.constant dense<0.000000e+00> : vector<16xf32>
    %10 = vector.multi_reduction <add>, %7, %cst_9 [1] : vector<16x32xf32> to vector<16xf32>
    %11 = vector.shape_cast %10 : vector<16xf32> to vector<16x1xf32>
    %cst_10 = arith.constant 3.200000e+01 : f32
    %12 = vector.broadcast %cst_10 : f32 to vector<16x1xf32>
    %13 = arith.divf %11, %12 : vector<16x1xf32>
    %14 = vector.broadcast %13 : vector<16x1xf32> to vector<16x32xf32>
    %15 = arith.subf %7, %14 : vector<16x32xf32>
    %16 = arith.mulf %15, %15 : vector<16x32xf32>
    %cst_11 = arith.constant dense<0.000000e+00> : vector<16xf32>
    %17 = vector.multi_reduction <add>, %16, %cst_11 [1] : vector<16x32xf32> to vector<16xf32>
    %18 = vector.shape_cast %17 : vector<16xf32> to vector<16x1xf32>
    %cst_12 = arith.constant 3.200000e+01 : f32
    %19 = vector.broadcast %cst_12 : f32 to vector<16x1xf32>
    %20 = arith.divf %18, %19 : vector<16x1xf32>
    %21 = vector.broadcast %13 : vector<16x1xf32> to vector<16x32xf32>
    %22 = arith.subf %7, %21 : vector<16x32xf32>
    %cst_13 = arith.constant 9.99999997E-7 : f32
    %23 = vector.broadcast %cst_13 : f32 to vector<16x1xf32>
    %24 = arith.addf %20, %23 : vector<16x1xf32>
    %25 = math.rsqrt %24 : vector<16x1xf32>
    %26 = vector.broadcast %25 : vector<16x1xf32> to vector<16x32xf32>
    %27 = arith.mulf %22, %26 : vector<16x32xf32>
    %28 = vector.broadcast %8 : vector<1x32xf32> to vector<16x32xf32>
    %29 = arith.mulf %27, %28 : vector<16x32xf32>
    %30 = vector.broadcast %9 : vector<1x32xf32> to vector<16x32xf32>
    %31 = arith.addf %29, %30 : vector<16x32xf32>
    %c0_14 = arith.constant 0 : index
    %c0_15 = arith.constant 0 : index
    %32 = vector.load %arg6[%c0_14, %c0_15] : memref<16x32xf32, #tpu.memory_space<vmem>>, vector<16x32xf32>
    tpu.vector_store %arg6[%c0_14, %c0_15], %31 {strides = array<i32>} : memref<16x32xf32, #tpu.memory_space<vmem>>, vector<16x32xf32>,
    return
  }
  func.func @transform_0(%arg0: i32) -> (i32, i32) {
    %c0_i32 = arith.constant 0 : i32
    %c0_i32_0 = arith.constant 0 : i32
    return %arg0, %c0_i32 : i32, i32
  }
  func.func @transform_1(%arg0: i32) -> (i32, i32) {
    %c0_i32 = arith.constant 0 : i32
    %c0_i32_0 = arith.constant 0 : i32
    %c0_i32_1 = arith.constant 0 : i32
    return %c0_i32, %c0_i32_0 : i32, i32
  }
  func.func @transform_2(%arg0: i32) -> (i32, i32) {
    %c0_i32 = arith.constant 0 : i32
    %c0_i32_0 = arith.constant 0 : i32
    %c0_i32_1 = arith.constant 0 : i32
    return %c0_i32, %c0_i32_0 : i32, i32
  }
  func.func @transform_3(%arg0: i32) -> (i32, i32) {
    %c0_i32 = arith.constant 0 : i32
    %c0_i32_0 = arith.constant 0 : i32
    %c0_i32_1 = arith.constant 0 : i32
    return %c0_i32, %c0_i32_0 : i32, i32
  }
  func.func @transform_4(%arg0: i32) -> (i32, i32) {
    %c0_i32 = arith.constant 0 : i32
    %c0_i32_0 = arith.constant 0 : i32
    %c0_i32_1 = arith.constant 0 : i32
    return %c0_i32, %c0_i32_0 : i32, i32
  }
  func.func @transform_5(%arg0: i32) -> (i32, i32) {
    %c0_i32 = arith.constant 0 : i32
    %c0_i32_0 = arith.constant 0 : i32
    return %arg0, %c0_i32 : i32, i32
  }
}

module attributes {stable_mosaic.version = 11 : i64} {
  func.func @_encoder_layer_kernel(%arg0: i32, %arg1: memref<1x8x32xf32, #tpu.memory_space<vmem>>, %arg2: memref<2x32x16xf32, #tpu.memory_space<vmem>>, %arg3: memref<2x1x16xf32, #tpu.memory_space<vmem>>, %arg4: memref<2x32x16xf32, #tpu.memory_space<vmem>>, %arg5: memref<2x1x16xf32, #tpu.memory_space<vmem>>, %arg6: memref<2x32x16xf32, #tpu.memory_space<vmem>>, %arg7: memref<2x1x16xf32, #tpu.memory_space<vmem>>, %arg8: memref<2x16x32xf32, #tpu.memory_space<vmem>>, %arg9: memref<1x32xf32, #tpu.memory_space<vmem>>, %arg10: memref<1x32xf32, #tpu.memory_space<vmem>>, %arg11: memref<1x32xf32, #tpu.memory_space<vmem>>, %arg12: memref<32x64xf32, #tpu.memory_space<vmem>>, %arg13: memref<1x64xf32, #tpu.memory_space<vmem>>, %arg14: memref<64x32xf32, #tpu.memory_space<vmem>>, %arg15: memref<1x32xf32, #tpu.memory_space<vmem>>, %arg16: memref<1x32xf32, #tpu.memory_space<vmem>>, %arg17: memref<1x32xf32, #tpu.memory_space<vmem>>, %arg18: memref<1x8x32xf32, #tpu.memory_space<vmem>>, %arg19: memref<1x8x32xf32, #tpu.memory_space<vmem>>) attributes {dimension_semantics = [#tpu.dimension_semantics<parallel>], iteration_bounds = array<i64: 2>, scalar_prefetch = 0 : i64, scratch_operands = 0 : i64, tpu.core_type = #tpu.core_type<tc>, window_params = [{transform_indices = @transform_0, window_bounds = array<i64: 1, 8, 32>}, {pipeline_mode = #tpu.pipeline_mode<synchronous>, transform_indices = @transform_1, window_bounds = array<i64: 2, 32, 16>}, {pipeline_mode = #tpu.pipeline_mode<synchronous>, transform_indices = @transform_2, window_bounds = array<i64: 2, 1, 16>}, {pipeline_mode = #tpu.pipeline_mode<synchronous>, transform_indices = @transform_3, window_bounds = array<i64: 2, 32, 16>}, {pipeline_mode = #tpu.pipeline_mode<synchronous>, transform_indices = @transform_4, window_bounds = array<i64: 2, 1, 16>}, {pipeline_mode = #tpu.pipeline_mode<synchronous>, transform_indices = @transform_5, window_bounds = array<i64: 2, 32, 16>}, {pipeline_mode = #tpu.pipeline_mode<synchronous>, transform_indices = @transform_6, window_bounds = array<i64: 2, 1, 16>}, {pipeline_mode = #tpu.pipeline_mode<synchronous>, transform_indices = @transform_7, window_bounds = array<i64: 2, 16, 32>}, {pipeline_mode = #tpu.pipeline_mode<synchronous>, transform_indices = @transform_8, window_bounds = array<i64: 1, 32>}, {pipeline_mode = #tpu.pipeline_mode<synchronous>, transform_indices = @transform_9, window_bounds = array<i64: 1, 32>}, {pipeline_mode = #tpu.pipeline_mode<synchronous>, transform_indices = @transform_10, window_bounds = array<i64: 1, 32>}, {pipeline_mode = #tpu.pipeline_mode<synchronous>, transform_indices = @transform_11, window_bounds = array<i64: 32, 64>}, {pipeline_mode = #tpu.pipeline_mode<synchronous>, transform_indices = @transform_12, window_bounds = array<i64: 1, 64>}, {pipeline_mode = #tpu.pipeline_mode<synchronous>, transform_indices = @transform_13, window_bounds = array<i64: 64, 32>}, {pipeline_mode = #tpu.pipeline_mode<synchronous>, transform_indices = @transform_14, window_bounds = array<i64: 1, 32>}, {pipeline_mode = #tpu.pipeline_mode<synchronous>, transform_indices = @transform_15, window_bounds = array<i64: 1, 32>}, {pipeline_mode = #tpu.pipeline_mode<synchronous>, transform_indices = @transform_16, window_bounds = array<i64: 1, 32>}, {transform_indices = @transform_17, window_bounds = array<i64: 1, 8, 32>}, {transform_indices = @transform_18, window_bounds = array<i64: 1, 8, 32>}]} {
    %c0 = arith.constant 0 : index
    %c0_0 = arith.constant 0 : index
    %c0_1 = arith.constant 0 : index
    %0 = vector.load %arg1[%c0, %c0_0, %c0_1] : memref<1x8x32xf32, #tpu.memory_space<vmem>>, vector<1x8x32xf32>
    %1 = vector.shape_cast %0 : vector<1x8x32xf32> to vector<8x32xf32>
    %c0_2 = arith.constant 0 : index
    %c0_3 = arith.constant 0 : index
    %c0_4 = arith.constant 0 : index
    %2 = vector.load %arg1[%c0_2, %c0_3, %c0_4] : memref<1x8x32xf32, #tpu.memory_space<vmem>>, vector<1x8x32xf32>
    %3 = vector.shape_cast %2 : vector<1x8x32xf32> to vector<8x32xf32>
    %4 = arith.truncf %3 : vector<8x32xf32> to vector<8x32xbf16>
    %cst = arith.constant 0.000000e+00 : f32
    %5 = vector.broadcast %cst : f32 to vector<8x32xf32>
    %c0_5 = arith.constant 0 : index
    %c0_6 = arith.constant 0 : index
    %c0_7 = arith.constant 0 : index
    %6 = vector.load %arg2[%c0_5, %c0_6, %c0_7] : memref<2x32x16xf32, #tpu.memory_space<vmem>>, vector<1x32x16xf32>
    %7 = vector.shape_cast %6 : vector<1x32x16xf32> to vector<32x16xf32>
    %8 = arith.truncf %7 : vector<32x16xf32> to vector<32x16xbf16>
    %cst_8 = arith.constant dense<0.000000e+00> : vector<8x16xf32>
    %9 = tpu.matmul %4, %8, %cst_8 {dimension_numbers = #tpu.dot_dimension_numbers<[1], [0], [0], [1], [0, 0, 1, 1], [], []>} : vector<8x32xbf16>, vector<32x16xbf16>, vector<8x16xf32> -> vector<8x16xf32>
    %c0_9 = arith.constant 0 : index
    %c0_10 = arith.constant 0 : index
    %c0_11 = arith.constant 0 : index
    %10 = vector.load %arg3[%c0_9, %c0_10, %c0_11] : memref<2x1x16xf32, #tpu.memory_space<vmem>>, vector<1x1x16xf32>
    %11 = vector.shape_cast %10 : vector<1x1x16xf32> to vector<1x16xf32>
    %12 = vector.broadcast %11 : vector<1x16xf32> to vector<8x16xf32>
    %13 = arith.addf %9, %12 : vector<8x16xf32>
    %c0_12 = arith.constant 0 : index
    %c0_13 = arith.constant 0 : index
    %c0_14 = arith.constant 0 : index
    %14 = vector.load %arg4[%c0_12, %c0_13, %c0_14] : memref<2x32x16xf32, #tpu.memory_space<vmem>>, vector<1x32x16xf32>
    %15 = vector.shape_cast %14 : vector<1x32x16xf32> to vector<32x16xf32>
    %16 = arith.truncf %15 : vector<32x16xf32> to vector<32x16xbf16>
    %cst_15 = arith.constant dense<0.000000e+00> : vector<8x16xf32>
    %17 = tpu.matmul %4, %16, %cst_15 {dimension_numbers = #tpu.dot_dimension_numbers<[1], [0], [0], [1], [0, 0, 1, 1], [], []>} : vector<8x32xbf16>, vector<32x16xbf16>, vector<8x16xf32> -> vector<8x16xf32>
    %c0_16 = arith.constant 0 : index
    %c0_17 = arith.constant 0 : index
    %c0_18 = arith.constant 0 : index
    %18 = vector.load %arg5[%c0_16, %c0_17, %c0_18] : memref<2x1x16xf32, #tpu.memory_space<vmem>>, vector<1x1x16xf32>
    %19 = vector.shape_cast %18 : vector<1x1x16xf32> to vector<1x16xf32>
    %20 = vector.broadcast %19 : vector<1x16xf32> to vector<8x16xf32>
    %21 = arith.addf %17, %20 : vector<8x16xf32>
    %c0_19 = arith.constant 0 : index
    %c0_20 = arith.constant 0 : index
    %c0_21 = arith.constant 0 : index
    %22 = vector.load %arg6[%c0_19, %c0_20, %c0_21] : memref<2x32x16xf32, #tpu.memory_space<vmem>>, vector<1x32x16xf32>
    %23 = vector.shape_cast %22 : vector<1x32x16xf32> to vector<32x16xf32>
    %24 = arith.truncf %23 : vector<32x16xf32> to vector<32x16xbf16>
    %cst_22 = arith.constant dense<0.000000e+00> : vector<8x16xf32>
    %25 = tpu.matmul %4, %24, %cst_22 {dimension_numbers = #tpu.dot_dimension_numbers<[1], [0], [0], [1], [0, 0, 1, 1], [], []>} : vector<8x32xbf16>, vector<32x16xbf16>, vector<8x16xf32> -> vector<8x16xf32>
    %c0_23 = arith.constant 0 : index
    %c0_24 = arith.constant 0 : index
    %c0_25 = arith.constant 0 : index
    %26 = vector.load %arg7[%c0_23, %c0_24, %c0_25] : memref<2x1x16xf32, #tpu.memory_space<vmem>>, vector<1x1x16xf32>
    %27 = vector.shape_cast %26 : vector<1x1x16xf32> to vector<1x16xf32>
    %28 = vector.broadcast %27 : vector<1x16xf32> to vector<8x16xf32>
    %29 = arith.addf %25, %28 : vector<8x16xf32>
    %30 = arith.truncf %13 : vector<8x16xf32> to vector<8x16xbf16>
    %31 = arith.truncf %21 : vector<8x16xf32> to vector<8x16xbf16>
    %cst_26 = arith.constant dense<0.000000e+00> : vector<8x8xf32>
    %32 = tpu.matmul %30, %31, %cst_26 {dimension_numbers = #tpu.dot_dimension_numbers<[1], [1], [0], [0], [0, 0, 1, 0], [], []>} : vector<8x16xbf16>, vector<8x16xbf16>, vector<8x8xf32> -> vector<8x8xf32>
    %cst_27 = arith.constant 2.500000e-01 : f32
    %33 = vector.broadcast %cst_27 : f32 to vector<8x8xf32>
    %34 = arith.mulf %32, %33 : vector<8x8xf32>
    %cst_28 = arith.constant dense<0xFF800000> : vector<8xf32>
    %35 = vector.multi_reduction <maximumf>, %34, %cst_28 [1] : vector<8x8xf32> to vector<8xf32>
    %36 = vector.shape_cast %35 : vector<8xf32> to vector<8x1xf32>
    %37 = vector.broadcast %36 : vector<8x1xf32> to vector<8x8xf32>
    %38 = arith.subf %34, %37 : vector<8x8xf32>
    %39 = math.exp %38 : vector<8x8xf32>
    %cst_29 = arith.constant dense<0.000000e+00> : vector<8xf32>
    %40 = vector.multi_reduction <add>, %39, %cst_29 [1] : vector<8x8xf32> to vector<8xf32>
    %41 = vector.shape_cast %40 : vector<8xf32> to vector<8x1xf32>
    %42 = tpu.reciprocal %41 {approx = true} : vector<8x1xf32> -> vector<8x1xf32>
    %43 = vector.broadcast %42 : vector<8x1xf32> to vector<8x8xf32>
    %44 = arith.mulf %39, %43 : vector<8x8xf32>
    %45 = arith.truncf %44 : vector<8x8xf32> to vector<8x8xbf16>
    %46 = arith.truncf %29 : vector<8x16xf32> to vector<8x16xbf16>
    %cst_30 = arith.constant dense<0.000000e+00> : vector<8x16xf32>
    %47 = tpu.matmul %45, %46, %cst_30 {dimension_numbers = #tpu.dot_dimension_numbers<[1], [0], [0], [1], [0, 0, 1, 1], [], []>} : vector<8x8xbf16>, vector<8x16xbf16>, vector<8x16xf32> -> vector<8x16xf32>
    %48 = arith.truncf %47 : vector<8x16xf32> to vector<8x16xbf16>
    %c0_31 = arith.constant 0 : index
    %c0_32 = arith.constant 0 : index
    %c0_33 = arith.constant 0 : index
    %49 = vector.load %arg8[%c0_31, %c0_32, %c0_33] : memref<2x16x32xf32, #tpu.memory_space<vmem>>, vector<1x16x32xf32>
    %50 = vector.shape_cast %49 : vector<1x16x32xf32> to vector<16x32xf32>
    %51 = arith.truncf %50 : vector<16x32xf32> to vector<16x32xbf16>
    %cst_34 = arith.constant dense<0.000000e+00> : vector<8x32xf32>
    %52 = tpu.matmul %48, %51, %cst_34 {dimension_numbers = #tpu.dot_dimension_numbers<[1], [0], [0], [1], [0, 0, 1, 1], [], []>} : vector<8x16xbf16>, vector<16x32xbf16>, vector<8x32xf32> -> vector<8x32xf32>
    %53 = arith.addf %5, %52 : vector<8x32xf32>
    %c1 = arith.constant 1 : index
    %c0_35 = arith.constant 0 : index
    %c0_36 = arith.constant 0 : index
    %54 = vector.load %arg2[%c1, %c0_35, %c0_36] : memref<2x32x16xf32, #tpu.memory_space<vmem>>, vector<1x32x16xf32>
    %55 = vector.shape_cast %54 : vector<1x32x16xf32> to vector<32x16xf32>
    %56 = arith.truncf %55 : vector<32x16xf32> to vector<32x16xbf16>
    %cst_37 = arith.constant dense<0.000000e+00> : vector<8x16xf32>
    %57 = tpu.matmul %4, %56, %cst_37 {dimension_numbers = #tpu.dot_dimension_numbers<[1], [0], [0], [1], [0, 0, 1, 1], [], []>} : vector<8x32xbf16>, vector<32x16xbf16>, vector<8x16xf32> -> vector<8x16xf32>
    %c1_38 = arith.constant 1 : index
    %c0_39 = arith.constant 0 : index
    %c0_40 = arith.constant 0 : index
    %58 = vector.load %arg3[%c1_38, %c0_39, %c0_40] : memref<2x1x16xf32, #tpu.memory_space<vmem>>, vector<1x1x16xf32>
    %59 = vector.shape_cast %58 : vector<1x1x16xf32> to vector<1x16xf32>
    %60 = vector.broadcast %59 : vector<1x16xf32> to vector<8x16xf32>
    %61 = arith.addf %57, %60 : vector<8x16xf32>
    %c1_41 = arith.constant 1 : index
    %c0_42 = arith.constant 0 : index
    %c0_43 = arith.constant 0 : index
    %62 = vector.load %arg4[%c1_41, %c0_42, %c0_43] : memref<2x32x16xf32, #tpu.memory_space<vmem>>, vector<1x32x16xf32>
    %63 = vector.shape_cast %62 : vector<1x32x16xf32> to vector<32x16xf32>
    %64 = arith.truncf %63 : vector<32x16xf32> to vector<32x16xbf16>
    %cst_44 = arith.constant dense<0.000000e+00> : vector<8x16xf32>
    %65 = tpu.matmul %4, %64, %cst_44 {dimension_numbers = #tpu.dot_dimension_numbers<[1], [0], [0], [1], [0, 0, 1, 1], [], []>} : vector<8x32xbf16>, vector<32x16xbf16>, vector<8x16xf32> -> vector<8x16xf32>
    %c1_45 = arith.constant 1 : index
    %c0_46 = arith.constant 0 : index
    %c0_47 = arith.constant 0 : index
    %66 = vector.load %arg5[%c1_45, %c0_46, %c0_47] : memref<2x1x16xf32, #tpu.memory_space<vmem>>, vector<1x1x16xf32>
    %67 = vector.shape_cast %66 : vector<1x1x16xf32> to vector<1x16xf32>
    %68 = vector.broadcast %67 : vector<1x16xf32> to vector<8x16xf32>
    %69 = arith.addf %65, %68 : vector<8x16xf32>
    %c1_48 = arith.constant 1 : index
    %c0_49 = arith.constant 0 : index
    %c0_50 = arith.constant 0 : index
    %70 = vector.load %arg6[%c1_48, %c0_49, %c0_50] : memref<2x32x16xf32, #tpu.memory_space<vmem>>, vector<1x32x16xf32>
    %71 = vector.shape_cast %70 : vector<1x32x16xf32> to vector<32x16xf32>
    %72 = arith.truncf %71 : vector<32x16xf32> to vector<32x16xbf16>
    %cst_51 = arith.constant dense<0.000000e+00> : vector<8x16xf32>
    %73 = tpu.matmul %4, %72, %cst_51 {dimension_numbers = #tpu.dot_dimension_numbers<[1], [0], [0], [1], [0, 0, 1, 1], [], []>} : vector<8x32xbf16>, vector<32x16xbf16>, vector<8x16xf32> -> vector<8x16xf32>
    %c1_52 = arith.constant 1 : index
    %c0_53 = arith.constant 0 : index
    %c0_54 = arith.constant 0 : index
    %74 = vector.load %arg7[%c1_52, %c0_53, %c0_54] : memref<2x1x16xf32, #tpu.memory_space<vmem>>, vector<1x1x16xf32>
    %75 = vector.shape_cast %74 : vector<1x1x16xf32> to vector<1x16xf32>
    %76 = vector.broadcast %75 : vector<1x16xf32> to vector<8x16xf32>
    %77 = arith.addf %73, %76 : vector<8x16xf32>
    %78 = arith.truncf %61 : vector<8x16xf32> to vector<8x16xbf16>
    %79 = arith.truncf %69 : vector<8x16xf32> to vector<8x16xbf16>
    %cst_55 = arith.constant dense<0.000000e+00> : vector<8x8xf32>
    %80 = tpu.matmul %78, %79, %cst_55 {dimension_numbers = #tpu.dot_dimension_numbers<[1], [1], [0], [0], [0, 0, 1, 0], [], []>} : vector<8x16xbf16>, vector<8x16xbf16>, vector<8x8xf32> -> vector<8x8xf32>
    %cst_56 = arith.constant 2.500000e-01 : f32
    %81 = vector.broadcast %cst_56 : f32 to vector<8x8xf32>
    %82 = arith.mulf %80, %81 : vector<8x8xf32>
    %cst_57 = arith.constant dense<0xFF800000> : vector<8xf32>
    %83 = vector.multi_reduction <maximumf>, %82, %cst_57 [1] : vector<8x8xf32> to vector<8xf32>
    %84 = vector.shape_cast %83 : vector<8xf32> to vector<8x1xf32>
    %85 = vector.broadcast %84 : vector<8x1xf32> to vector<8x8xf32>
    %86 = arith.subf %82, %85 : vector<8x8xf32>
    %87 = math.exp %86 : vector<8x8xf32>
    %cst_58 = arith.constant dense<0.000000e+00> : vector<8xf32>
    %88 = vector.multi_reduction <add>, %87, %cst_58 [1] : vector<8x8xf32> to vector<8xf32>
    %89 = vector.shape_cast %88 : vector<8xf32> to vector<8x1xf32>
    %90 = tpu.reciprocal %89 {approx = true} : vector<8x1xf32> -> vector<8x1xf32>
    %91 = vector.broadcast %90 : vector<8x1xf32> to vector<8x8xf32>
    %92 = arith.mulf %87, %91 : vector<8x8xf32>
    %93 = arith.truncf %92 : vector<8x8xf32> to vector<8x8xbf16>
    %94 = arith.truncf %77 : vector<8x16xf32> to vector<8x16xbf16>
    %cst_59 = arith.constant dense<0.000000e+00> : vector<8x16xf32>
    %95 = tpu.matmul %93, %94, %cst_59 {dimension_numbers = #tpu.dot_dimension_numbers<[1], [0], [0], [1], [0, 0, 1, 1], [], []>} : vector<8x8xbf16>, vector<8x16xbf16>, vector<8x16xf32> -> vector<8x16xf32>
    %96 = arith.truncf %95 : vector<8x16xf32> to vector<8x16xbf16>
    %c1_60 = arith.constant 1 : index
    %c0_61 = arith.constant 0 : index
    %c0_62 = arith.constant 0 : index
    %97 = vector.load %arg8[%c1_60, %c0_61, %c0_62] : memref<2x16x32xf32, #tpu.memory_space<vmem>>, vector<1x16x32xf32>
    %98 = vector.shape_cast %97 : vector<1x16x32xf32> to vector<16x32xf32>
    %99 = arith.truncf %98 : vector<16x32xf32> to vector<16x32xbf16>
    %cst_63 = arith.constant dense<0.000000e+00> : vector<8x32xf32>
    %100 = tpu.matmul %96, %99, %cst_63 {dimension_numbers = #tpu.dot_dimension_numbers<[1], [0], [0], [1], [0, 0, 1, 1], [], []>} : vector<8x16xbf16>, vector<16x32xbf16>, vector<8x32xf32> -> vector<8x32xf32>
    %101 = arith.addf %53, %100 : vector<8x32xf32>
    %c0_64 = arith.constant 0 : index
    %c0_65 = arith.constant 0 : index
    %102 = vector.load %arg9[%c0_64, %c0_65] : memref<1x32xf32, #tpu.memory_space<vmem>>, vector<1x32xf32>
    %103 = vector.broadcast %102 : vector<1x32xf32> to vector<8x32xf32>
    %104 = arith.addf %101, %103 : vector<8x32xf32>
    %105 = arith.addf %104, %1 : vector<8x32xf32>
    %c0_66 = arith.constant 0 : index
    %c0_67 = arith.constant 0 : index
    %106 = vector.load %arg10[%c0_66, %c0_67] : memref<1x32xf32, #tpu.memory_space<vmem>>, vector<1x32xf32>
    %c0_68 = arith.constant 0 : index
    %c0_69 = arith.constant 0 : index
    %107 = vector.load %arg11[%c0_68, %c0_69] : memref<1x32xf32, #tpu.memory_space<vmem>>, vector<1x32xf32>
    %cst_70 = arith.constant dense<0.000000e+00> : vector<8xf32>
    %108 = vector.multi_reduction <add>, %105, %cst_70 [1] : vector<8x32xf32> to vector<8xf32>
    %109 = vector.shape_cast %108 : vector<8xf32> to vector<8x1xf32>
    %cst_71 = arith.constant 3.200000e+01 : f32
    %110 = vector.broadcast %cst_71 : f32 to vector<8x1xf32>
    %111 = arith.divf %109, %110 : vector<8x1xf32>
    %112 = vector.broadcast %111 : vector<8x1xf32> to vector<8x32xf32>
    %113 = arith.subf %105, %112 : vector<8x32xf32>
    %114 = arith.mulf %113, %113 : vector<8x32xf32>
    %cst_72 = arith.constant dense<0.000000e+00> : vector<8xf32>
    %115 = vector.multi_reduction <add>, %114, %cst_72 [1] : vector<8x32xf32> to vector<8xf32>
    %116 = vector.shape_cast %115 : vector<8xf32> to vector<8x1xf32>
    %cst_73 = arith.constant 3.200000e+01 : f32
    %117 = vector.broadcast %cst_73 : f32 to vector<8x1xf32>
    %118 = arith.divf %116, %117 : vector<8x1xf32>
    %119 = vector.broadcast %111 : vector<8x1xf32> to vector<8x32xf32>
    %120 = arith.subf %105, %119 : vector<8x32xf32>
    %cst_74 = arith.constant 9.99999997E-7 : f32
    %121 = vector.broadcast %cst_74 : f32 to vector<8x1xf32>
    %122 = arith.addf %118, %121 : vector<8x1xf32>
    %123 = math.rsqrt %122 : vector<8x1xf32>
    %124 = vector.broadcast %123 : vector<8x1xf32> to vector<8x32xf32>
    %125 = arith.mulf %120, %124 : vector<8x32xf32>
    %126 = vector.broadcast %106 : vector<1x32xf32> to vector<8x32xf32>
    %127 = arith.mulf %125, %126 : vector<8x32xf32>
    %128 = vector.broadcast %107 : vector<1x32xf32> to vector<8x32xf32>
    %129 = arith.addf %127, %128 : vector<8x32xf32>
    %c0_75 = arith.constant 0 : index
    %c0_76 = arith.constant 0 : index
    %c0_77 = arith.constant 0 : index
    %130 = vector.load %arg18[%c0_75, %c0_76, %c0_77] : memref<1x8x32xf32, #tpu.memory_space<vmem>>, vector<1x8x32xf32>
    %131 = vector.shape_cast %130 : vector<1x8x32xf32> to vector<8x32xf32>
    %132 = vector.shape_cast %129 : vector<8x32xf32> to vector<1x8x32xf32>
    tpu.vector_store %arg18[%c0_75, %c0_76, %c0_77], %132 {strides = array<i32>} : memref<1x8x32xf32, #tpu.memory_space<vmem>>, vector<1x8x32xf32>,
    %133 = arith.truncf %129 : vector<8x32xf32> to vector<8x32xbf16>
    %c0_78 = arith.constant 0 : index
    %c0_79 = arith.constant 0 : index
    %134 = vector.load %arg12[%c0_78, %c0_79] : memref<32x64xf32, #tpu.memory_space<vmem>>, vector<32x64xf32>
    %135 = arith.truncf %134 : vector<32x64xf32> to vector<32x64xbf16>
    %cst_80 = arith.constant dense<0.000000e+00> : vector<8x64xf32>
    %136 = tpu.matmul %133, %135, %cst_80 {dimension_numbers = #tpu.dot_dimension_numbers<[1], [0], [0], [1], [0, 0, 1, 1], [], []>} : vector<8x32xbf16>, vector<32x64xbf16>, vector<8x64xf32> -> vector<8x64xf32>
    %c0_81 = arith.constant 0 : index
    %c0_82 = arith.constant 0 : index
    %137 = vector.load %arg13[%c0_81, %c0_82] : memref<1x64xf32, #tpu.memory_space<vmem>>, vector<1x64xf32>
    %138 = vector.broadcast %137 : vector<1x64xf32> to vector<8x64xf32>
    %139 = arith.addf %136, %138 : vector<8x64xf32>
    %cst_83 = arith.constant 0.000000e+00 : f32
    %140 = vector.broadcast %cst_83 : f32 to vector<8x64xf32>
    %141 = arith.maximumf %139, %140 : vector<8x64xf32>
    %142 = arith.truncf %141 : vector<8x64xf32> to vector<8x64xbf16>
    %c0_84 = arith.constant 0 : index
    %c0_85 = arith.constant 0 : index
    %143 = vector.load %arg14[%c0_84, %c0_85] : memref<64x32xf32, #tpu.memory_space<vmem>>, vector<64x32xf32>
    %144 = arith.truncf %143 : vector<64x32xf32> to vector<64x32xbf16>
    %cst_86 = arith.constant dense<0.000000e+00> : vector<8x32xf32>
    %145 = tpu.matmul %142, %144, %cst_86 {dimension_numbers = #tpu.dot_dimension_numbers<[1], [0], [0], [1], [0, 0, 1, 1], [], []>} : vector<8x64xbf16>, vector<64x32xbf16>, vector<8x32xf32> -> vector<8x32xf32>
    %c0_87 = arith.constant 0 : index
    %c0_88 = arith.constant 0 : index
    %146 = vector.load %arg15[%c0_87, %c0_88] : memref<1x32xf32, #tpu.memory_space<vmem>>, vector<1x32xf32>
    %147 = vector.broadcast %146 : vector<1x32xf32> to vector<8x32xf32>
    %148 = arith.addf %145, %147 : vector<8x32xf32>
    %149 = arith.addf %148, %129 : vector<8x32xf32>
    %c0_89 = arith.constant 0 : index
    %c0_90 = arith.constant 0 : index
    %150 = vector.load %arg16[%c0_89, %c0_90] : memref<1x32xf32, #tpu.memory_space<vmem>>, vector<1x32xf32>
    %c0_91 = arith.constant 0 : index
    %c0_92 = arith.constant 0 : index
    %151 = vector.load %arg17[%c0_91, %c0_92] : memref<1x32xf32, #tpu.memory_space<vmem>>, vector<1x32xf32>
    %cst_93 = arith.constant dense<0.000000e+00> : vector<8xf32>
    %152 = vector.multi_reduction <add>, %149, %cst_93 [1] : vector<8x32xf32> to vector<8xf32>
    %153 = vector.shape_cast %152 : vector<8xf32> to vector<8x1xf32>
    %cst_94 = arith.constant 3.200000e+01 : f32
    %154 = vector.broadcast %cst_94 : f32 to vector<8x1xf32>
    %155 = arith.divf %153, %154 : vector<8x1xf32>
    %156 = vector.broadcast %155 : vector<8x1xf32> to vector<8x32xf32>
    %157 = arith.subf %149, %156 : vector<8x32xf32>
    %158 = arith.mulf %157, %157 : vector<8x32xf32>
    %cst_95 = arith.constant dense<0.000000e+00> : vector<8xf32>
    %159 = vector.multi_reduction <add>, %158, %cst_95 [1] : vector<8x32xf32> to vector<8xf32>
    %160 = vector.shape_cast %159 : vector<8xf32> to vector<8x1xf32>
    %cst_96 = arith.constant 3.200000e+01 : f32
    %161 = vector.broadcast %cst_96 : f32 to vector<8x1xf32>
    %162 = arith.divf %160, %161 : vector<8x1xf32>
    %163 = vector.broadcast %155 : vector<8x1xf32> to vector<8x32xf32>
    %164 = arith.subf %149, %163 : vector<8x32xf32>
    %cst_97 = arith.constant 9.99999997E-7 : f32
    %165 = vector.broadcast %cst_97 : f32 to vector<8x1xf32>
    %166 = arith.addf %162, %165 : vector<8x1xf32>
    %167 = math.rsqrt %166 : vector<8x1xf32>
    %168 = vector.broadcast %167 : vector<8x1xf32> to vector<8x32xf32>
    %169 = arith.mulf %164, %168 : vector<8x32xf32>
    %170 = vector.broadcast %150 : vector<1x32xf32> to vector<8x32xf32>
    %171 = arith.mulf %169, %170 : vector<8x32xf32>
    %172 = vector.broadcast %151 : vector<1x32xf32> to vector<8x32xf32>
    %173 = arith.addf %171, %172 : vector<8x32xf32>
    %c0_98 = arith.constant 0 : index
    %c0_99 = arith.constant 0 : index
    %c0_100 = arith.constant 0 : index
    %174 = vector.load %arg19[%c0_98, %c0_99, %c0_100] : memref<1x8x32xf32, #tpu.memory_space<vmem>>, vector<1x8x32xf32>
    %175 = vector.shape_cast %174 : vector<1x8x32xf32> to vector<8x32xf32>
    %176 = vector.shape_cast %173 : vector<8x32xf32> to vector<1x8x32xf32>
    tpu.vector_store %arg19[%c0_98, %c0_99, %c0_100], %176 {strides = array<i32>} : memref<1x8x32xf32, #tpu.memory_space<vmem>>, vector<1x8x32xf32>,
    return
  }
  func.func @transform_0(%arg0: i32) -> (i32, i32, i32) {
    %c0_i32 = arith.constant 0 : i32
    %c0_i32_0 = arith.constant 0 : i32
    %c0_i32_1 = arith.constant 0 : i32
    return %arg0, %c0_i32, %c0_i32_0 : i32, i32, i32
  }
  func.func @transform_1(%arg0: i32) -> (i32, i32, i32) {
    %c0_i32 = arith.constant 0 : i32
    %c0_i32_0 = arith.constant 0 : i32
    %c0_i32_1 = arith.constant 0 : i32
    %c0_i32_2 = arith.constant 0 : i32
    return %c0_i32, %c0_i32_0, %c0_i32_1 : i32, i32, i32
  }
  func.func @transform_2(%arg0: i32) -> (i32, i32, i32) {
    %c0_i32 = arith.constant 0 : i32
    %c0_i32_0 = arith.constant 0 : i32
    %c0_i32_1 = arith.constant 0 : i32
    %c0_i32_2 = arith.constant 0 : i32
    return %c0_i32, %c0_i32_0, %c0_i32_1 : i32, i32, i32
  }
  func.func @transform_3(%arg0: i32) -> (i32, i32, i32) {
    %c0_i32 = arith.constant 0 : i32
    %c0_i32_0 = arith.constant 0 : i32
    %c0_i32_1 = arith.constant 0 : i32
    %c0_i32_2 = arith.constant 0 : i32
    return %c0_i32, %c0_i32_0, %c0_i32_1 : i32, i32, i32
  }
  func.func @transform_4(%arg0: i32) -> (i32, i32, i32) {
    %c0_i32 = arith.constant 0 : i32
    %c0_i32_0 = arith.constant 0 : i32
    %c0_i32_1 = arith.constant 0 : i32
    %c0_i32_2 = arith.constant 0 : i32
    return %c0_i32, %c0_i32_0, %c0_i32_1 : i32, i32, i32
  }
  func.func @transform_5(%arg0: i32) -> (i32, i32, i32) {
    %c0_i32 = arith.constant 0 : i32
    %c0_i32_0 = arith.constant 0 : i32
    %c0_i32_1 = arith.constant 0 : i32
    %c0_i32_2 = arith.constant 0 : i32
    return %c0_i32, %c0_i32_0, %c0_i32_1 : i32, i32, i32
  }
  func.func @transform_6(%arg0: i32) -> (i32, i32, i32) {
    %c0_i32 = arith.constant 0 : i32
    %c0_i32_0 = arith.constant 0 : i32
    %c0_i32_1 = arith.constant 0 : i32
    %c0_i32_2 = arith.constant 0 : i32
    return %c0_i32, %c0_i32_0, %c0_i32_1 : i32, i32, i32
  }
  func.func @transform_7(%arg0: i32) -> (i32, i32, i32) {
    %c0_i32 = arith.constant 0 : i32
    %c0_i32_0 = arith.constant 0 : i32
    %c0_i32_1 = arith.constant 0 : i32
    %c0_i32_2 = arith.constant 0 : i32
    return %c0_i32, %c0_i32_0, %c0_i32_1 : i32, i32, i32
  }
  func.func @transform_8(%arg0: i32) -> (i32, i32) {
    %c0_i32 = arith.constant 0 : i32
    %c0_i32_0 = arith.constant 0 : i32
    %c0_i32_1 = arith.constant 0 : i32
    return %c0_i32, %c0_i32_0 : i32, i32
  }
  func.func @transform_9(%arg0: i32) -> (i32, i32) {
    %c0_i32 = arith.constant 0 : i32
    %c0_i32_0 = arith.constant 0 : i32
    %c0_i32_1 = arith.constant 0 : i32
    return %c0_i32, %c0_i32_0 : i32, i32
  }
  func.func @transform_10(%arg0: i32) -> (i32, i32) {
    %c0_i32 = arith.constant 0 : i32
    %c0_i32_0 = arith.constant 0 : i32
    %c0_i32_1 = arith.constant 0 : i32
    return %c0_i32, %c0_i32_0 : i32, i32
  }
  func.func @transform_11(%arg0: i32) -> (i32, i32) {
    %c0_i32 = arith.constant 0 : i32
    %c0_i32_0 = arith.constant 0 : i32
    %c0_i32_1 = arith.constant 0 : i32
    return %c0_i32, %c0_i32_0 : i32, i32
  }
  func.func @transform_12(%arg0: i32) -> (i32, i32) {
    %c0_i32 = arith.constant 0 : i32
    %c0_i32_0 = arith.constant 0 : i32
    %c0_i32_1 = arith.constant 0 : i32
    return %c0_i32, %c0_i32_0 : i32, i32
  }
  func.func @transform_13(%arg0: i32) -> (i32, i32) {
    %c0_i32 = arith.constant 0 : i32
    %c0_i32_0 = arith.constant 0 : i32
    %c0_i32_1 = arith.constant 0 : i32
    return %c0_i32, %c0_i32_0 : i32, i32
  }
  func.func @transform_14(%arg0: i32) -> (i32, i32) {
    %c0_i32 = arith.constant 0 : i32
    %c0_i32_0 = arith.constant 0 : i32
    %c0_i32_1 = arith.constant 0 : i32
    return %c0_i32, %c0_i32_0 : i32, i32
  }
  func.func @transform_15(%arg0: i32) -> (i32, i32) {
    %c0_i32 = arith.constant 0 : i32
    %c0_i32_0 = arith.constant 0 : i32
    %c0_i32_1 = arith.constant 0 : i32
    return %c0_i32, %c0_i32_0 : i32, i32
  }
  func.func @transform_16(%arg0: i32) -> (i32, i32) {
    %c0_i32 = arith.constant 0 : i32
    %c0_i32_0 = arith.constant 0 : i32
    %c0_i32_1 = arith.constant 0 : i32
    return %c0_i32, %c0_i32_0 : i32, i32
  }
  func.func @transform_17(%arg0: i32) -> (i32, i32, i32) {
    %c0_i32 = arith.constant 0 : i32
    %c0_i32_0 = arith.constant 0 : i32
    %c0_i32_1 = arith.constant 0 : i32
    return %arg0, %c0_i32, %c0_i32_0 : i32, i32, i32
  }
  func.func @transform_18(%arg0: i32) -> (i32, i32, i32) {
    %c0_i32 = arith.constant 0 : i32
    %c0_i32_0 = arith.constant 0 : i32
    %c0_i32_1 = arith.constant 0 : i32
    return %arg0, %c0_i32, %c0_i32_0 : i32, i32, i32
  }
}

module attributes {stable_mosaic.version = 11 : i64} {
  func.func @_score_kernel(%arg0: i32, %arg1: memref<16x32xf32, #tpu.memory_space<vmem>>, %arg2: memref<32x32xf32, #tpu.memory_space<vmem>>, %arg3: memref<1x32xf32, #tpu.memory_space<vmem>>, %arg4: memref<1x32xf32, #tpu.memory_space<vmem>>, %arg5: memref<1x32xf32, #tpu.memory_space<vmem>>, %arg6: memref<1x32xf32, #tpu.memory_space<vmem>>, %arg7: memref<1x1xf32, #tpu.memory_space<vmem>>, %arg8: memref<1x16xf32, #tpu.memory_space<vmem>>) attributes {dimension_semantics = [#tpu.dimension_semantics<parallel>], iteration_bounds = array<i64: 1>, scalar_prefetch = 0 : i64, scratch_operands = 0 : i64, tpu.core_type = #tpu.core_type<tc>, window_params = [{transform_indices = @transform_0, window_bounds = array<i64: 16, 32>}, {pipeline_mode = #tpu.pipeline_mode<synchronous>, transform_indices = @transform_1, window_bounds = array<i64: 32, 32>}, {pipeline_mode = #tpu.pipeline_mode<synchronous>, transform_indices = @transform_2, window_bounds = array<i64: 1, 32>}, {pipeline_mode = #tpu.pipeline_mode<synchronous>, transform_indices = @transform_3, window_bounds = array<i64: 1, 32>}, {pipeline_mode = #tpu.pipeline_mode<synchronous>, transform_indices = @transform_4, window_bounds = array<i64: 1, 32>}, {pipeline_mode = #tpu.pipeline_mode<synchronous>, transform_indices = @transform_5, window_bounds = array<i64: 1, 32>}, {pipeline_mode = #tpu.pipeline_mode<synchronous>, transform_indices = @transform_6, window_bounds = array<i64: 1, 1>}, {transform_indices = @transform_7, window_bounds = array<i64: 1, 16>}]} {
    %c0 = arith.constant 0 : index
    %c0_0 = arith.constant 0 : index
    %0 = vector.load %arg1[%c0, %c0_0] : memref<16x32xf32, #tpu.memory_space<vmem>>, vector<16x32xf32>
    %1 = arith.truncf %0 : vector<16x32xf32> to vector<16x32xbf16>
    %c0_1 = arith.constant 0 : index
    %c0_2 = arith.constant 0 : index
    %2 = vector.load %arg2[%c0_1, %c0_2] : memref<32x32xf32, #tpu.memory_space<vmem>>, vector<32x32xf32>
    %3 = arith.truncf %2 : vector<32x32xf32> to vector<32x32xbf16>
    %cst = arith.constant dense<0.000000e+00> : vector<16x32xf32>
    %4 = tpu.matmul %1, %3, %cst {dimension_numbers = #tpu.dot_dimension_numbers<[1], [0], [0], [1], [0, 0, 1, 1], [], []>} : vector<16x32xbf16>, vector<32x32xbf16>, vector<16x32xf32> -> vector<16x32xf32>
    %c0_3 = arith.constant 0 : index
    %c0_4 = arith.constant 0 : index
    %5 = vector.load %arg3[%c0_3, %c0_4] : memref<1x32xf32, #tpu.memory_space<vmem>>, vector<1x32xf32>
    %6 = vector.broadcast %5 : vector<1x32xf32> to vector<16x32xf32>
    %7 = arith.addf %4, %6 : vector<16x32xf32>
    %cst_5 = arith.constant 0.000000e+00 : f32
    %8 = vector.broadcast %cst_5 : f32 to vector<16x32xf32>
    %9 = arith.maximumf %7, %8 : vector<16x32xf32>
    %c0_6 = arith.constant 0 : index
    %c0_7 = arith.constant 0 : index
    %10 = vector.load %arg6[%c0_6, %c0_7] : memref<1x32xf32, #tpu.memory_space<vmem>>, vector<1x32xf32>
    %11 = arith.truncf %10 : vector<1x32xf32> to vector<1x32xbf16>
    %12 = arith.truncf %9 : vector<16x32xf32> to vector<16x32xbf16>
    %cst_8 = arith.constant dense<0.000000e+00> : vector<1x16xf32>
    %13 = tpu.matmul %11, %12, %cst_8 {dimension_numbers = #tpu.dot_dimension_numbers<[1], [1], [0], [0], [0, 0, 1, 0], [], []>} : vector<1x32xbf16>, vector<16x32xbf16>, vector<1x16xf32> -> vector<1x16xf32>
    %c0_9 = arith.constant 0 : index
    %c0_10 = arith.constant 0 : index
    %14 = vector.load %arg7[%c0_9, %c0_10] : memref<1x1xf32, #tpu.memory_space<vmem>>, vector<1x1xf32>
    %15 = vector.broadcast %14 : vector<1x1xf32> to vector<1x16xf32>
    %16 = arith.addf %13, %15 : vector<1x16xf32>
    %17 = arith.negf %16 : vector<1x16xf32>
    %18 = math.exp %17 : vector<1x16xf32>
    %cst_11 = arith.constant 1.000000e+00 : f32
    %19 = vector.broadcast %cst_11 : f32 to vector<1x16xf32>
    %20 = arith.addf %19, %18 : vector<1x16xf32>
    %21 = arith.divf %19, %20 : vector<1x16xf32>
    %c0_12 = arith.constant 0 : index
    %c0_13 = arith.constant 0 : index
    %22 = vector.load %arg8[%c0_12, %c0_13] : memref<1x16xf32, #tpu.memory_space<vmem>>, vector<1x16xf32>
    tpu.vector_store %arg8[%c0_12, %c0_13], %21 {strides = array<i32>} : memref<1x16xf32, #tpu.memory_space<vmem>>, vector<1x16xf32>,
    return
  }
  func.func @transform_0(%arg0: i32) -> (i32, i32) {
    %c0_i32 = arith.constant 0 : i32
    %c0_i32_0 = arith.constant 0 : i32
    return %arg0, %c0_i32 : i32, i32
  }
  func.func @transform_1(%arg0: i32) -> (i32, i32) {
    %c0_i32 = arith.constant 0 : i32
    %c0_i32_0 = arith.constant 0 : i32
    %c0_i32_1 = arith.constant 0 : i32
    return %c0_i32, %c0_i32_0 : i32, i32
  }
  func.func @transform_2(%arg0: i32) -> (i32, i32) {
    %c0_i32 = arith.constant 0 : i32
    %c0_i32_0 = arith.constant 0 : i32
    %c0_i32_1 = arith.constant 0 : i32
    return %c0_i32, %c0_i32_0 : i32, i32
  }
  func.func @transform_3(%arg0: i32) -> (i32, i32) {
    %c0_i32 = arith.constant 0 : i32
    %c0_i32_0 = arith.constant 0 : i32
    %c0_i32_1 = arith.constant 0 : i32
    return %c0_i32, %c0_i32_0 : i32, i32
  }
  func.func @transform_4(%arg0: i32) -> (i32, i32) {
    %c0_i32 = arith.constant 0 : i32
    %c0_i32_0 = arith.constant 0 : i32
    %c0_i32_1 = arith.constant 0 : i32
    return %c0_i32, %c0_i32_0 : i32, i32
  }
  func.func @transform_5(%arg0: i32) -> (i32, i32) {
    %c0_i32 = arith.constant 0 : i32
    %c0_i32_0 = arith.constant 0 : i32
    %c0_i32_1 = arith.constant 0 : i32
    return %c0_i32, %c0_i32_0 : i32, i32
  }
  func.func @transform_6(%arg0: i32) -> (i32, i32) {
    %c0_i32 = arith.constant 0 : i32
    %c0_i32_0 = arith.constant 0 : i32
    %c0_i32_1 = arith.constant 0 : i32
    return %c0_i32, %c0_i32_0 : i32, i32
  }
  func.func @transform_7(%arg0: i32) -> (i32, i32) {
    %c0_i32 = arith.constant 0 : i32
    %c0_i32_0 = arith.constant 0 : i32
    return %c0_i32, %arg0 : i32, i32
  }
}

module attributes {stable_mosaic.version = 11 : i64} {
  func.func @_encoder_layer_kernel(%arg0: i32, %arg1: memref<1x8x32xf32, #tpu.memory_space<vmem>>, %arg2: memref<2x32x16xf32, #tpu.memory_space<vmem>>, %arg3: memref<2x1x16xf32, #tpu.memory_space<vmem>>, %arg4: memref<2x32x16xf32, #tpu.memory_space<vmem>>, %arg5: memref<2x1x16xf32, #tpu.memory_space<vmem>>, %arg6: memref<2x32x16xf32, #tpu.memory_space<vmem>>, %arg7: memref<2x1x16xf32, #tpu.memory_space<vmem>>, %arg8: memref<2x16x32xf32, #tpu.memory_space<vmem>>, %arg9: memref<1x32xf32, #tpu.memory_space<vmem>>, %arg10: memref<1x32xf32, #tpu.memory_space<vmem>>, %arg11: memref<1x32xf32, #tpu.memory_space<vmem>>, %arg12: memref<32x64xf32, #tpu.memory_space<vmem>>, %arg13: memref<1x64xf32, #tpu.memory_space<vmem>>, %arg14: memref<64x32xf32, #tpu.memory_space<vmem>>, %arg15: memref<1x32xf32, #tpu.memory_space<vmem>>, %arg16: memref<1x32xf32, #tpu.memory_space<vmem>>, %arg17: memref<1x32xf32, #tpu.memory_space<vmem>>, %arg18: memref<1x8x32xf32, #tpu.memory_space<vmem>>, %arg19: memref<1x8x32xf32, #tpu.memory_space<vmem>>) attributes {dimension_semantics = [#tpu.dimension_semantics<parallel>], iteration_bounds = array<i64: 2>, scalar_prefetch = 0 : i64, scratch_operands = 0 : i64, tpu.core_type = #tpu.core_type<tc>, window_params = [{transform_indices = @transform_0, window_bounds = array<i64: 1, 8, 32>}, {pipeline_mode = #tpu.pipeline_mode<synchronous>, transform_indices = @transform_1, window_bounds = array<i64: 2, 32, 16>}, {pipeline_mode = #tpu.pipeline_mode<synchronous>, transform_indices = @transform_2, window_bounds = array<i64: 2, 1, 16>}, {pipeline_mode = #tpu.pipeline_mode<synchronous>, transform_indices = @transform_3, window_bounds = array<i64: 2, 32, 16>}, {pipeline_mode = #tpu.pipeline_mode<synchronous>, transform_indices = @transform_4, window_bounds = array<i64: 2, 1, 16>}, {pipeline_mode = #tpu.pipeline_mode<synchronous>, transform_indices = @transform_5, window_bounds = array<i64: 2, 32, 16>}, {pipeline_mode = #tpu.pipeline_mode<synchronous>, transform_indices = @transform_6, window_bounds = array<i64: 2, 1, 16>}, {pipeline_mode = #tpu.pipeline_mode<synchronous>, transform_indices = @transform_7, window_bounds = array<i64: 2, 16, 32>}, {pipeline_mode = #tpu.pipeline_mode<synchronous>, transform_indices = @transform_8, window_bounds = array<i64: 1, 32>}, {pipeline_mode = #tpu.pipeline_mode<synchronous>, transform_indices = @transform_9, window_bounds = array<i64: 1, 32>}, {pipeline_mode = #tpu.pipeline_mode<synchronous>, transform_indices = @transform_10, window_bounds = array<i64: 1, 32>}, {pipeline_mode = #tpu.pipeline_mode<synchronous>, transform_indices = @transform_11, window_bounds = array<i64: 32, 64>}, {pipeline_mode = #tpu.pipeline_mode<synchronous>, transform_indices = @transform_12, window_bounds = array<i64: 1, 64>}, {pipeline_mode = #tpu.pipeline_mode<synchronous>, transform_indices = @transform_13, window_bounds = array<i64: 64, 32>}, {pipeline_mode = #tpu.pipeline_mode<synchronous>, transform_indices = @transform_14, window_bounds = array<i64: 1, 32>}, {pipeline_mode = #tpu.pipeline_mode<synchronous>, transform_indices = @transform_15, window_bounds = array<i64: 1, 32>}, {pipeline_mode = #tpu.pipeline_mode<synchronous>, transform_indices = @transform_16, window_bounds = array<i64: 1, 32>}, {transform_indices = @transform_17, window_bounds = array<i64: 1, 8, 32>}, {transform_indices = @transform_18, window_bounds = array<i64: 1, 8, 32>}]} {
    %c0 = arith.constant 0 : index
    %c0_0 = arith.constant 0 : index
    %c0_1 = arith.constant 0 : index
    %0 = vector.load %arg1[%c0, %c0_0, %c0_1] : memref<1x8x32xf32, #tpu.memory_space<vmem>>, vector<1x8x32xf32>
    %1 = vector.shape_cast %0 : vector<1x8x32xf32> to vector<8x32xf32>
    %c0_2 = arith.constant 0 : index
    %c0_3 = arith.constant 0 : index
    %c0_4 = arith.constant 0 : index
    %2 = vector.load %arg1[%c0_2, %c0_3, %c0_4] : memref<1x8x32xf32, #tpu.memory_space<vmem>>, vector<1x8x32xf32>
    %3 = vector.shape_cast %2 : vector<1x8x32xf32> to vector<8x32xf32>
    %4 = arith.truncf %3 : vector<8x32xf32> to vector<8x32xbf16>
    %cst = arith.constant 0.000000e+00 : f32
    %5 = vector.broadcast %cst : f32 to vector<8x32xf32>
    %c0_5 = arith.constant 0 : index
    %c0_6 = arith.constant 0 : index
    %c0_7 = arith.constant 0 : index
    %6 = vector.load %arg2[%c0_5, %c0_6, %c0_7] : memref<2x32x16xf32, #tpu.memory_space<vmem>>, vector<1x32x16xf32>
    %7 = vector.shape_cast %6 : vector<1x32x16xf32> to vector<32x16xf32>
    %8 = arith.truncf %7 : vector<32x16xf32> to vector<32x16xbf16>
    %cst_8 = arith.constant dense<0.000000e+00> : vector<8x16xf32>
    %9 = tpu.matmul %4, %8, %cst_8 {dimension_numbers = #tpu.dot_dimension_numbers<[1], [0], [0], [1], [0, 0, 1, 1], [], []>} : vector<8x32xbf16>, vector<32x16xbf16>, vector<8x16xf32> -> vector<8x16xf32>
    %c0_9 = arith.constant 0 : index
    %c0_10 = arith.constant 0 : index
    %c0_11 = arith.constant 0 : index
    %10 = vector.load %arg3[%c0_9, %c0_10, %c0_11] : memref<2x1x16xf32, #tpu.memory_space<vmem>>, vector<1x1x16xf32>
    %11 = vector.shape_cast %10 : vector<1x1x16xf32> to vector<1x16xf32>
    %12 = vector.broadcast %11 : vector<1x16xf32> to vector<8x16xf32>
    %13 = arith.addf %9, %12 : vector<8x16xf32>
    %c0_12 = arith.constant 0 : index
    %c0_13 = arith.constant 0 : index
    %c0_14 = arith.constant 0 : index
    %14 = vector.load %arg4[%c0_12, %c0_13, %c0_14] : memref<2x32x16xf32, #tpu.memory_space<vmem>>, vector<1x32x16xf32>
    %15 = vector.shape_cast %14 : vector<1x32x16xf32> to vector<32x16xf32>
    %16 = arith.truncf %15 : vector<32x16xf32> to vector<32x16xbf16>
    %cst_15 = arith.constant dense<0.000000e+00> : vector<8x16xf32>
    %17 = tpu.matmul %4, %16, %cst_15 {dimension_numbers = #tpu.dot_dimension_numbers<[1], [0], [0], [1], [0, 0, 1, 1], [], []>} : vector<8x32xbf16>, vector<32x16xbf16>, vector<8x16xf32> -> vector<8x16xf32>
    %c0_16 = arith.constant 0 : index
    %c0_17 = arith.constant 0 : index
    %c0_18 = arith.constant 0 : index
    %18 = vector.load %arg5[%c0_16, %c0_17, %c0_18] : memref<2x1x16xf32, #tpu.memory_space<vmem>>, vector<1x1x16xf32>
    %19 = vector.shape_cast %18 : vector<1x1x16xf32> to vector<1x16xf32>
    %20 = vector.broadcast %19 : vector<1x16xf32> to vector<8x16xf32>
    %21 = arith.addf %17, %20 : vector<8x16xf32>
    %c0_19 = arith.constant 0 : index
    %c0_20 = arith.constant 0 : index
    %c0_21 = arith.constant 0 : index
    %22 = vector.load %arg6[%c0_19, %c0_20, %c0_21] : memref<2x32x16xf32, #tpu.memory_space<vmem>>, vector<1x32x16xf32>
    %23 = vector.shape_cast %22 : vector<1x32x16xf32> to vector<32x16xf32>
    %24 = arith.truncf %23 : vector<32x16xf32> to vector<32x16xbf16>
    %cst_22 = arith.constant dense<0.000000e+00> : vector<8x16xf32>
    %25 = tpu.matmul %4, %24, %cst_22 {dimension_numbers = #tpu.dot_dimension_numbers<[1], [0], [0], [1], [0, 0, 1, 1], [], []>} : vector<8x32xbf16>, vector<32x16xbf16>, vector<8x16xf32> -> vector<8x16xf32>
    %c0_23 = arith.constant 0 : index
    %c0_24 = arith.constant 0 : index
    %c0_25 = arith.constant 0 : index
    %26 = vector.load %arg7[%c0_23, %c0_24, %c0_25] : memref<2x1x16xf32, #tpu.memory_space<vmem>>, vector<1x1x16xf32>
    %27 = vector.shape_cast %26 : vector<1x1x16xf32> to vector<1x16xf32>
    %28 = vector.broadcast %27 : vector<1x16xf32> to vector<8x16xf32>
    %29 = arith.addf %25, %28 : vector<8x16xf32>
    %30 = arith.truncf %13 : vector<8x16xf32> to vector<8x16xbf16>
    %31 = arith.truncf %21 : vector<8x16xf32> to vector<8x16xbf16>
    %cst_26 = arith.constant dense<0.000000e+00> : vector<8x8xf32>
    %32 = tpu.matmul %30, %31, %cst_26 {dimension_numbers = #tpu.dot_dimension_numbers<[1], [1], [0], [0], [0, 0, 1, 0], [], []>} : vector<8x16xbf16>, vector<8x16xbf16>, vector<8x8xf32> -> vector<8x8xf32>
    %cst_27 = arith.constant 2.500000e-01 : f32
    %33 = vector.broadcast %cst_27 : f32 to vector<8x8xf32>
    %34 = arith.mulf %32, %33 : vector<8x8xf32>
    %cst_28 = arith.constant dense<0xFF800000> : vector<8xf32>
    %35 = vector.multi_reduction <maximumf>, %34, %cst_28 [1] : vector<8x8xf32> to vector<8xf32>
    %36 = vector.shape_cast %35 : vector<8xf32> to vector<8x1xf32>
    %37 = vector.broadcast %36 : vector<8x1xf32> to vector<8x8xf32>
    %38 = arith.subf %34, %37 : vector<8x8xf32>
    %39 = math.exp %38 : vector<8x8xf32>
    %cst_29 = arith.constant dense<0.000000e+00> : vector<8xf32>
    %40 = vector.multi_reduction <add>, %39, %cst_29 [1] : vector<8x8xf32> to vector<8xf32>
    %41 = vector.shape_cast %40 : vector<8xf32> to vector<8x1xf32>
    %42 = tpu.reciprocal %41 {approx = true} : vector<8x1xf32> -> vector<8x1xf32>
    %43 = vector.broadcast %42 : vector<8x1xf32> to vector<8x8xf32>
    %44 = arith.mulf %39, %43 : vector<8x8xf32>
    %45 = arith.truncf %44 : vector<8x8xf32> to vector<8x8xbf16>
    %46 = arith.truncf %29 : vector<8x16xf32> to vector<8x16xbf16>
    %cst_30 = arith.constant dense<0.000000e+00> : vector<8x16xf32>
    %47 = tpu.matmul %45, %46, %cst_30 {dimension_numbers = #tpu.dot_dimension_numbers<[1], [0], [0], [1], [0, 0, 1, 1], [], []>} : vector<8x8xbf16>, vector<8x16xbf16>, vector<8x16xf32> -> vector<8x16xf32>
    %48 = arith.truncf %47 : vector<8x16xf32> to vector<8x16xbf16>
    %c0_31 = arith.constant 0 : index
    %c0_32 = arith.constant 0 : index
    %c0_33 = arith.constant 0 : index
    %49 = vector.load %arg8[%c0_31, %c0_32, %c0_33] : memref<2x16x32xf32, #tpu.memory_space<vmem>>, vector<1x16x32xf32>
    %50 = vector.shape_cast %49 : vector<1x16x32xf32> to vector<16x32xf32>
    %51 = arith.truncf %50 : vector<16x32xf32> to vector<16x32xbf16>
    %cst_34 = arith.constant dense<0.000000e+00> : vector<8x32xf32>
    %52 = tpu.matmul %48, %51, %cst_34 {dimension_numbers = #tpu.dot_dimension_numbers<[1], [0], [0], [1], [0, 0, 1, 1], [], []>} : vector<8x16xbf16>, vector<16x32xbf16>, vector<8x32xf32> -> vector<8x32xf32>
    %53 = arith.addf %5, %52 : vector<8x32xf32>
    %c1 = arith.constant 1 : index
    %c0_35 = arith.constant 0 : index
    %c0_36 = arith.constant 0 : index
    %54 = vector.load %arg2[%c1, %c0_35, %c0_36] : memref<2x32x16xf32, #tpu.memory_space<vmem>>, vector<1x32x16xf32>
    %55 = vector.shape_cast %54 : vector<1x32x16xf32> to vector<32x16xf32>
    %56 = arith.truncf %55 : vector<32x16xf32> to vector<32x16xbf16>
    %cst_37 = arith.constant dense<0.000000e+00> : vector<8x16xf32>
    %57 = tpu.matmul %4, %56, %cst_37 {dimension_numbers = #tpu.dot_dimension_numbers<[1], [0], [0], [1], [0, 0, 1, 1], [], []>} : vector<8x32xbf16>, vector<32x16xbf16>, vector<8x16xf32> -> vector<8x16xf32>
    %c1_38 = arith.constant 1 : index
    %c0_39 = arith.constant 0 : index
    %c0_40 = arith.constant 0 : index
    %58 = vector.load %arg3[%c1_38, %c0_39, %c0_40] : memref<2x1x16xf32, #tpu.memory_space<vmem>>, vector<1x1x16xf32>
    %59 = vector.shape_cast %58 : vector<1x1x16xf32> to vector<1x16xf32>
    %60 = vector.broadcast %59 : vector<1x16xf32> to vector<8x16xf32>
    %61 = arith.addf %57, %60 : vector<8x16xf32>
    %c1_41 = arith.constant 1 : index
    %c0_42 = arith.constant 0 : index
    %c0_43 = arith.constant 0 : index
    %62 = vector.load %arg4[%c1_41, %c0_42, %c0_43] : memref<2x32x16xf32, #tpu.memory_space<vmem>>, vector<1x32x16xf32>
    %63 = vector.shape_cast %62 : vector<1x32x16xf32> to vector<32x16xf32>
    %64 = arith.truncf %63 : vector<32x16xf32> to vector<32x16xbf16>
    %cst_44 = arith.constant dense<0.000000e+00> : vector<8x16xf32>
    %65 = tpu.matmul %4, %64, %cst_44 {dimension_numbers = #tpu.dot_dimension_numbers<[1], [0], [0], [1], [0, 0, 1, 1], [], []>} : vector<8x32xbf16>, vector<32x16xbf16>, vector<8x16xf32> -> vector<8x16xf32>
    %c1_45 = arith.constant 1 : index
    %c0_46 = arith.constant 0 : index
    %c0_47 = arith.constant 0 : index
    %66 = vector.load %arg5[%c1_45, %c0_46, %c0_47] : memref<2x1x16xf32, #tpu.memory_space<vmem>>, vector<1x1x16xf32>
    %67 = vector.shape_cast %66 : vector<1x1x16xf32> to vector<1x16xf32>
    %68 = vector.broadcast %67 : vector<1x16xf32> to vector<8x16xf32>
    %69 = arith.addf %65, %68 : vector<8x16xf32>
    %c1_48 = arith.constant 1 : index
    %c0_49 = arith.constant 0 : index
    %c0_50 = arith.constant 0 : index
    %70 = vector.load %arg6[%c1_48, %c0_49, %c0_50] : memref<2x32x16xf32, #tpu.memory_space<vmem>>, vector<1x32x16xf32>
    %71 = vector.shape_cast %70 : vector<1x32x16xf32> to vector<32x16xf32>
    %72 = arith.truncf %71 : vector<32x16xf32> to vector<32x16xbf16>
    %cst_51 = arith.constant dense<0.000000e+00> : vector<8x16xf32>
    %73 = tpu.matmul %4, %72, %cst_51 {dimension_numbers = #tpu.dot_dimension_numbers<[1], [0], [0], [1], [0, 0, 1, 1], [], []>} : vector<8x32xbf16>, vector<32x16xbf16>, vector<8x16xf32> -> vector<8x16xf32>
    %c1_52 = arith.constant 1 : index
    %c0_53 = arith.constant 0 : index
    %c0_54 = arith.constant 0 : index
    %74 = vector.load %arg7[%c1_52, %c0_53, %c0_54] : memref<2x1x16xf32, #tpu.memory_space<vmem>>, vector<1x1x16xf32>
    %75 = vector.shape_cast %74 : vector<1x1x16xf32> to vector<1x16xf32>
    %76 = vector.broadcast %75 : vector<1x16xf32> to vector<8x16xf32>
    %77 = arith.addf %73, %76 : vector<8x16xf32>
    %78 = arith.truncf %61 : vector<8x16xf32> to vector<8x16xbf16>
    %79 = arith.truncf %69 : vector<8x16xf32> to vector<8x16xbf16>
    %cst_55 = arith.constant dense<0.000000e+00> : vector<8x8xf32>
    %80 = tpu.matmul %78, %79, %cst_55 {dimension_numbers = #tpu.dot_dimension_numbers<[1], [1], [0], [0], [0, 0, 1, 0], [], []>} : vector<8x16xbf16>, vector<8x16xbf16>, vector<8x8xf32> -> vector<8x8xf32>
    %cst_56 = arith.constant 2.500000e-01 : f32
    %81 = vector.broadcast %cst_56 : f32 to vector<8x8xf32>
    %82 = arith.mulf %80, %81 : vector<8x8xf32>
    %cst_57 = arith.constant dense<0xFF800000> : vector<8xf32>
    %83 = vector.multi_reduction <maximumf>, %82, %cst_57 [1] : vector<8x8xf32> to vector<8xf32>
    %84 = vector.shape_cast %83 : vector<8xf32> to vector<8x1xf32>
    %85 = vector.broadcast %84 : vector<8x1xf32> to vector<8x8xf32>
    %86 = arith.subf %82, %85 : vector<8x8xf32>
    %87 = math.exp %86 : vector<8x8xf32>
    %cst_58 = arith.constant dense<0.000000e+00> : vector<8xf32>
    %88 = vector.multi_reduction <add>, %87, %cst_58 [1] : vector<8x8xf32> to vector<8xf32>
    %89 = vector.shape_cast %88 : vector<8xf32> to vector<8x1xf32>
    %90 = tpu.reciprocal %89 {approx = true} : vector<8x1xf32> -> vector<8x1xf32>
    %91 = vector.broadcast %90 : vector<8x1xf32> to vector<8x8xf32>
    %92 = arith.mulf %87, %91 : vector<8x8xf32>
    %93 = arith.truncf %92 : vector<8x8xf32> to vector<8x8xbf16>
    %94 = arith.truncf %77 : vector<8x16xf32> to vector<8x16xbf16>
    %cst_59 = arith.constant dense<0.000000e+00> : vector<8x16xf32>
    %95 = tpu.matmul %93, %94, %cst_59 {dimension_numbers = #tpu.dot_dimension_numbers<[1], [0], [0], [1], [0, 0, 1, 1], [], []>} : vector<8x8xbf16>, vector<8x16xbf16>, vector<8x16xf32> -> vector<8x16xf32>
    %96 = arith.truncf %95 : vector<8x16xf32> to vector<8x16xbf16>
    %c1_60 = arith.constant 1 : index
    %c0_61 = arith.constant 0 : index
    %c0_62 = arith.constant 0 : index
    %97 = vector.load %arg8[%c1_60, %c0_61, %c0_62] : memref<2x16x32xf32, #tpu.memory_space<vmem>>, vector<1x16x32xf32>
    %98 = vector.shape_cast %97 : vector<1x16x32xf32> to vector<16x32xf32>
    %99 = arith.truncf %98 : vector<16x32xf32> to vector<16x32xbf16>
    %cst_63 = arith.constant dense<0.000000e+00> : vector<8x32xf32>
    %100 = tpu.matmul %96, %99, %cst_63 {dimension_numbers = #tpu.dot_dimension_numbers<[1], [0], [0], [1], [0, 0, 1, 1], [], []>} : vector<8x16xbf16>, vector<16x32xbf16>, vector<8x32xf32> -> vector<8x32xf32>
    %101 = arith.addf %53, %100 : vector<8x32xf32>
    %c0_64 = arith.constant 0 : index
    %c0_65 = arith.constant 0 : index
    %102 = vector.load %arg9[%c0_64, %c0_65] : memref<1x32xf32, #tpu.memory_space<vmem>>, vector<1x32xf32>
    %103 = vector.broadcast %102 : vector<1x32xf32> to vector<8x32xf32>
    %104 = arith.addf %101, %103 : vector<8x32xf32>
    %105 = arith.addf %104, %1 : vector<8x32xf32>
    %c0_66 = arith.constant 0 : index
    %c0_67 = arith.constant 0 : index
    %106 = vector.load %arg10[%c0_66, %c0_67] : memref<1x32xf32, #tpu.memory_space<vmem>>, vector<1x32xf32>
    %c0_68 = arith.constant 0 : index
    %c0_69 = arith.constant 0 : index
    %107 = vector.load %arg11[%c0_68, %c0_69] : memref<1x32xf32, #tpu.memory_space<vmem>>, vector<1x32xf32>
    %cst_70 = arith.constant dense<0.000000e+00> : vector<8xf32>
    %108 = vector.multi_reduction <add>, %105, %cst_70 [1] : vector<8x32xf32> to vector<8xf32>
    %109 = vector.shape_cast %108 : vector<8xf32> to vector<8x1xf32>
    %cst_71 = arith.constant 3.200000e+01 : f32
    %110 = vector.broadcast %cst_71 : f32 to vector<8x1xf32>
    %111 = arith.divf %109, %110 : vector<8x1xf32>
    %112 = vector.broadcast %111 : vector<8x1xf32> to vector<8x32xf32>
    %113 = arith.subf %105, %112 : vector<8x32xf32>
    %114 = arith.mulf %113, %113 : vector<8x32xf32>
    %cst_72 = arith.constant dense<0.000000e+00> : vector<8xf32>
    %115 = vector.multi_reduction <add>, %114, %cst_72 [1] : vector<8x32xf32> to vector<8xf32>
    %116 = vector.shape_cast %115 : vector<8xf32> to vector<8x1xf32>
    %cst_73 = arith.constant 3.200000e+01 : f32
    %117 = vector.broadcast %cst_73 : f32 to vector<8x1xf32>
    %118 = arith.divf %116, %117 : vector<8x1xf32>
    %119 = vector.broadcast %111 : vector<8x1xf32> to vector<8x32xf32>
    %120 = arith.subf %105, %119 : vector<8x32xf32>
    %cst_74 = arith.constant 9.99999997E-7 : f32
    %121 = vector.broadcast %cst_74 : f32 to vector<8x1xf32>
    %122 = arith.addf %118, %121 : vector<8x1xf32>
    %123 = math.rsqrt %122 : vector<8x1xf32>
    %124 = vector.broadcast %123 : vector<8x1xf32> to vector<8x32xf32>
    %125 = arith.mulf %120, %124 : vector<8x32xf32>
    %126 = vector.broadcast %106 : vector<1x32xf32> to vector<8x32xf32>
    %127 = arith.mulf %125, %126 : vector<8x32xf32>
    %128 = vector.broadcast %107 : vector<1x32xf32> to vector<8x32xf32>
    %129 = arith.addf %127, %128 : vector<8x32xf32>
    %c0_75 = arith.constant 0 : index
    %c0_76 = arith.constant 0 : index
    %c0_77 = arith.constant 0 : index
    %130 = vector.load %arg18[%c0_75, %c0_76, %c0_77] : memref<1x8x32xf32, #tpu.memory_space<vmem>>, vector<1x8x32xf32>
    %131 = vector.shape_cast %130 : vector<1x8x32xf32> to vector<8x32xf32>
    %132 = vector.shape_cast %129 : vector<8x32xf32> to vector<1x8x32xf32>
    tpu.vector_store %arg18[%c0_75, %c0_76, %c0_77], %132 {strides = array<i32>} : memref<1x8x32xf32, #tpu.memory_space<vmem>>, vector<1x8x32xf32>,
    %133 = arith.truncf %129 : vector<8x32xf32> to vector<8x32xbf16>
    %c0_78 = arith.constant 0 : index
    %c0_79 = arith.constant 0 : index
    %134 = vector.load %arg12[%c0_78, %c0_79] : memref<32x64xf32, #tpu.memory_space<vmem>>, vector<32x64xf32>
    %135 = arith.truncf %134 : vector<32x64xf32> to vector<32x64xbf16>
    %cst_80 = arith.constant dense<0.000000e+00> : vector<8x64xf32>
    %136 = tpu.matmul %133, %135, %cst_80 {dimension_numbers = #tpu.dot_dimension_numbers<[1], [0], [0], [1], [0, 0, 1, 1], [], []>} : vector<8x32xbf16>, vector<32x64xbf16>, vector<8x64xf32> -> vector<8x64xf32>
    %c0_81 = arith.constant 0 : index
    %c0_82 = arith.constant 0 : index
    %137 = vector.load %arg13[%c0_81, %c0_82] : memref<1x64xf32, #tpu.memory_space<vmem>>, vector<1x64xf32>
    %138 = vector.broadcast %137 : vector<1x64xf32> to vector<8x64xf32>
    %139 = arith.addf %136, %138 : vector<8x64xf32>
    %cst_83 = arith.constant 0.000000e+00 : f32
    %140 = vector.broadcast %cst_83 : f32 to vector<8x64xf32>
    %141 = arith.maximumf %139, %140 : vector<8x64xf32>
    %142 = arith.truncf %141 : vector<8x64xf32> to vector<8x64xbf16>
    %c0_84 = arith.constant 0 : index
    %c0_85 = arith.constant 0 : index
    %143 = vector.load %arg14[%c0_84, %c0_85] : memref<64x32xf32, #tpu.memory_space<vmem>>, vector<64x32xf32>
    %144 = arith.truncf %143 : vector<64x32xf32> to vector<64x32xbf16>
    %cst_86 = arith.constant dense<0.000000e+00> : vector<8x32xf32>
    %145 = tpu.matmul %142, %144, %cst_86 {dimension_numbers = #tpu.dot_dimension_numbers<[1], [0], [0], [1], [0, 0, 1, 1], [], []>} : vector<8x64xbf16>, vector<64x32xbf16>, vector<8x32xf32> -> vector<8x32xf32>
    %c0_87 = arith.constant 0 : index
    %c0_88 = arith.constant 0 : index
    %146 = vector.load %arg15[%c0_87, %c0_88] : memref<1x32xf32, #tpu.memory_space<vmem>>, vector<1x32xf32>
    %147 = vector.broadcast %146 : vector<1x32xf32> to vector<8x32xf32>
    %148 = arith.addf %145, %147 : vector<8x32xf32>
    %149 = arith.addf %148, %129 : vector<8x32xf32>
    %c0_89 = arith.constant 0 : index
    %c0_90 = arith.constant 0 : index
    %150 = vector.load %arg16[%c0_89, %c0_90] : memref<1x32xf32, #tpu.memory_space<vmem>>, vector<1x32xf32>
    %c0_91 = arith.constant 0 : index
    %c0_92 = arith.constant 0 : index
    %151 = vector.load %arg17[%c0_91, %c0_92] : memref<1x32xf32, #tpu.memory_space<vmem>>, vector<1x32xf32>
    %cst_93 = arith.constant dense<0.000000e+00> : vector<8xf32>
    %152 = vector.multi_reduction <add>, %149, %cst_93 [1] : vector<8x32xf32> to vector<8xf32>
    %153 = vector.shape_cast %152 : vector<8xf32> to vector<8x1xf32>
    %cst_94 = arith.constant 3.200000e+01 : f32
    %154 = vector.broadcast %cst_94 : f32 to vector<8x1xf32>
    %155 = arith.divf %153, %154 : vector<8x1xf32>
    %156 = vector.broadcast %155 : vector<8x1xf32> to vector<8x32xf32>
    %157 = arith.subf %149, %156 : vector<8x32xf32>
    %158 = arith.mulf %157, %157 : vector<8x32xf32>
    %cst_95 = arith.constant dense<0.000000e+00> : vector<8xf32>
    %159 = vector.multi_reduction <add>, %158, %cst_95 [1] : vector<8x32xf32> to vector<8xf32>
    %160 = vector.shape_cast %159 : vector<8xf32> to vector<8x1xf32>
    %cst_96 = arith.constant 3.200000e+01 : f32
    %161 = vector.broadcast %cst_96 : f32 to vector<8x1xf32>
    %162 = arith.divf %160, %161 : vector<8x1xf32>
    %163 = vector.broadcast %155 : vector<8x1xf32> to vector<8x32xf32>
    %164 = arith.subf %149, %163 : vector<8x32xf32>
    %cst_97 = arith.constant 9.99999997E-7 : f32
    %165 = vector.broadcast %cst_97 : f32 to vector<8x1xf32>
    %166 = arith.addf %162, %165 : vector<8x1xf32>
    %167 = math.rsqrt %166 : vector<8x1xf32>
    %168 = vector.broadcast %167 : vector<8x1xf32> to vector<8x32xf32>
    %169 = arith.mulf %164, %168 : vector<8x32xf32>
    %170 = vector.broadcast %150 : vector<1x32xf32> to vector<8x32xf32>
    %171 = arith.mulf %169, %170 : vector<8x32xf32>
    %172 = vector.broadcast %151 : vector<1x32xf32> to vector<8x32xf32>
    %173 = arith.addf %171, %172 : vector<8x32xf32>
    %c0_98 = arith.constant 0 : index
    %c0_99 = arith.constant 0 : index
    %c0_100 = arith.constant 0 : index
    %174 = vector.load %arg19[%c0_98, %c0_99, %c0_100] : memref<1x8x32xf32, #tpu.memory_space<vmem>>, vector<1x8x32xf32>
    %175 = vector.shape_cast %174 : vector<1x8x32xf32> to vector<8x32xf32>
    %176 = vector.shape_cast %173 : vector<8x32xf32> to vector<1x8x32xf32>
    tpu.vector_store %arg19[%c0_98, %c0_99, %c0_100], %176 {strides = array<i32>} : memref<1x8x32xf32, #tpu.memory_space<vmem>>, vector<1x8x32xf32>,
    return
  }
  func.func @transform_0(%arg0: i32) -> (i32, i32, i32) {
    %c0_i32 = arith.constant 0 : i32
    %c0_i32_0 = arith.constant 0 : i32
    %c0_i32_1 = arith.constant 0 : i32
    return %arg0, %c0_i32, %c0_i32_0 : i32, i32, i32
  }
  func.func @transform_1(%arg0: i32) -> (i32, i32, i32) {
    %c0_i32 = arith.constant 0 : i32
    %c0_i32_0 = arith.constant 0 : i32
    %c0_i32_1 = arith.constant 0 : i32
    %c0_i32_2 = arith.constant 0 : i32
    return %c0_i32, %c0_i32_0, %c0_i32_1 : i32, i32, i32
  }
  func.func @transform_2(%arg0: i32) -> (i32, i32, i32) {
    %c0_i32 = arith.constant 0 : i32
    %c0_i32_0 = arith.constant 0 : i32
    %c0_i32_1 = arith.constant 0 : i32
    %c0_i32_2 = arith.constant 0 : i32
    return %c0_i32, %c0_i32_0, %c0_i32_1 : i32, i32, i32
  }
  func.func @transform_3(%arg0: i32) -> (i32, i32, i32) {
    %c0_i32 = arith.constant 0 : i32
    %c0_i32_0 = arith.constant 0 : i32
    %c0_i32_1 = arith.constant 0 : i32
    %c0_i32_2 = arith.constant 0 : i32
    return %c0_i32, %c0_i32_0, %c0_i32_1 : i32, i32, i32
  }
  func.func @transform_4(%arg0: i32) -> (i32, i32, i32) {
    %c0_i32 = arith.constant 0 : i32
    %c0_i32_0 = arith.constant 0 : i32
    %c0_i32_1 = arith.constant 0 : i32
    %c0_i32_2 = arith.constant 0 : i32
    return %c0_i32, %c0_i32_0, %c0_i32_1 : i32, i32, i32
  }
  func.func @transform_5(%arg0: i32) -> (i32, i32, i32) {
    %c0_i32 = arith.constant 0 : i32
    %c0_i32_0 = arith.constant 0 : i32
    %c0_i32_1 = arith.constant 0 : i32
    %c0_i32_2 = arith.constant 0 : i32
    return %c0_i32, %c0_i32_0, %c0_i32_1 : i32, i32, i32
  }
  func.func @transform_6(%arg0: i32) -> (i32, i32, i32) {
    %c0_i32 = arith.constant 0 : i32
    %c0_i32_0 = arith.constant 0 : i32
    %c0_i32_1 = arith.constant 0 : i32
    %c0_i32_2 = arith.constant 0 : i32
    return %c0_i32, %c0_i32_0, %c0_i32_1 : i32, i32, i32
  }
  func.func @transform_7(%arg0: i32) -> (i32, i32, i32) {
    %c0_i32 = arith.constant 0 : i32
    %c0_i32_0 = arith.constant 0 : i32
    %c0_i32_1 = arith.constant 0 : i32
    %c0_i32_2 = arith.constant 0 : i32
    return %c0_i32, %c0_i32_0, %c0_i32_1 : i32, i32, i32
  }
  func.func @transform_8(%arg0: i32) -> (i32, i32) {
    %c0_i32 = arith.constant 0 : i32
    %c0_i32_0 = arith.constant 0 : i32
    %c0_i32_1 = arith.constant 0 : i32
    return %c0_i32, %c0_i32_0 : i32, i32
  }
  func.func @transform_9(%arg0: i32) -> (i32, i32) {
    %c0_i32 = arith.constant 0 : i32
    %c0_i32_0 = arith.constant 0 : i32
    %c0_i32_1 = arith.constant 0 : i32
    return %c0_i32, %c0_i32_0 : i32, i32
  }
  func.func @transform_10(%arg0: i32) -> (i32, i32) {
    %c0_i32 = arith.constant 0 : i32
    %c0_i32_0 = arith.constant 0 : i32
    %c0_i32_1 = arith.constant 0 : i32
    return %c0_i32, %c0_i32_0 : i32, i32
  }
  func.func @transform_11(%arg0: i32) -> (i32, i32) {
    %c0_i32 = arith.constant 0 : i32
    %c0_i32_0 = arith.constant 0 : i32
    %c0_i32_1 = arith.constant 0 : i32
    return %c0_i32, %c0_i32_0 : i32, i32
  }
  func.func @transform_12(%arg0: i32) -> (i32, i32) {
    %c0_i32 = arith.constant 0 : i32
    %c0_i32_0 = arith.constant 0 : i32
    %c0_i32_1 = arith.constant 0 : i32
    return %c0_i32, %c0_i32_0 : i32, i32
  }
  func.func @transform_13(%arg0: i32) -> (i32, i32) {
    %c0_i32 = arith.constant 0 : i32
    %c0_i32_0 = arith.constant 0 : i32
    %c0_i32_1 = arith.constant 0 : i32
    return %c0_i32, %c0_i32_0 : i32, i32
  }
  func.func @transform_14(%arg0: i32) -> (i32, i32) {
    %c0_i32 = arith.constant 0 : i32
    %c0_i32_0 = arith.constant 0 : i32
    %c0_i32_1 = arith.constant 0 : i32
    return %c0_i32, %c0_i32_0 : i32, i32
  }
  func.func @transform_15(%arg0: i32) -> (i32, i32) {
    %c0_i32 = arith.constant 0 : i32
    %c0_i32_0 = arith.constant 0 : i32
    %c0_i32_1 = arith.constant 0 : i32
    return %c0_i32, %c0_i32_0 : i32, i32
  }
  func.func @transform_16(%arg0: i32) -> (i32, i32) {
    %c0_i32 = arith.constant 0 : i32
    %c0_i32_0 = arith.constant 0 : i32
    %c0_i32_1 = arith.constant 0 : i32
    return %c0_i32, %c0_i32_0 : i32, i32
  }
  func.func @transform_17(%arg0: i32) -> (i32, i32, i32) {
    %c0_i32 = arith.constant 0 : i32
    %c0_i32_0 = arith.constant 0 : i32
    %c0_i32_1 = arith.constant 0 : i32
    return %arg0, %c0_i32, %c0_i32_0 : i32, i32, i32
  }
  func.func @transform_18(%arg0: i32) -> (i32, i32, i32) {
    %c0_i32 = arith.constant 0 : i32
    %c0_i32_0 = arith.constant 0 : i32
    %c0_i32_1 = arith.constant 0 : i32
    return %arg0, %c0_i32, %c0_i32_0 : i32, i32, i32
  }
}

</mosaic_0001>

<bundles_post_ra>
// kernel: sum_cap_encoder_forward.4
= control target key start
LH: loop header
LB: loop body
LE: loop exit
PB: predicated region body
PF: predicated region fallthrough
CT: control target
= control target key end

     0   :  { %vm34_vm0 = vcmask 261120   ;;  %v132_v16 = vmov 32.0   ;;  %s203_s1 = inlined_call_operand.vmem [shape: f32[32,32], index: 1, kind: input, shape index: {}]   ;;  %s204_s0 = inlined_call_operand.vmem [shape: f32[16,32], index: 0, kind: input, shape index: {}]   ;;  %s205_s2 = inlined_call_operand.vmem [shape: f32[1,32], index: 2, kind: input, shape index: {}]   ;;  %s206_s3 = inlined_call_operand.vmem [shape: f32[1,32], index: 3, kind: input, shape index: {}]   ;;  %s207_s4 = inlined_call_operand.vmem [shape: f32[1,32], index: 4, kind: input, shape index: {}]   ;;  %s208_s5 = inlined_call_operand.vmem [shape: f32[16,32], index: 5, kind: output, shape index: {}]  }
   0x1   :  { %v26_v0 = vld [vmem:[%s203_s1 + $0x10] sm:$0xff]  ;;  %v27_v1 = vld [vmem:[%s203_s1 + $0x18] sm:$0xff]  ;;  %v24_v2 = vld [vmem:[%s203_s1] sm:$0xff]  ;;  %126 = vrcp.f32 %v132_v16 }
   0x2   :  { %v29_v3 = vpack.c.bf16 %v27_v1, %v26_v0  ;;  %v25_v4 = vld [vmem:[%s203_s1 + $0x8] sm:$0xff]  ;;  %v21_v6 = vld [vmem:[%s204_s0] sm:$0xff] }
   0x3   :  { %v28_v5 = vpack.c.bf16 %v25_v4, %v24_v2  ;;  %v22_v7 = vld [vmem:[%s204_s0 + $0x8] sm:$0xff]  ;;  %v123_v9 = vld [vmem:[%s205_s2] ss:$0 sm:$0xff] }
   0x4   :  { %44 = vmatpush.bf16.msra.mxu0 %v29_v3  ;;  %v23_v8 = vpack.c.bf16 %v22_v7, %v21_v6  ;;  %v124_v47 = vld [vmem:[%s206_s3] ss:$0 sm:$0xff] }
   0x5   :  { %v125_v50 = vld [vmem:[%s207_s4] ss:$0 sm:$0xff] }
   0x7   :  { %v127_v17 = vpop.eup %126 }
   0x8   :  { %45 = vmatpush.bf16.msra.mxu0 %v28_v5  ;;  %v61_v18 = vmul.f32 32.0, %v127_v17  ;;  %vm65_vm1 = vweird.f32 %v127_v17 }
   0xa   :  { %v62_v19 = vsub.f32 1.0, %v61_v18 }
   0xb   :  { %121 = vmatmul.msk.bf16.vlgmr.msra.gmra.mxu0 %vm34_vm0, %v23_v8 }
   0xc   :  { %v63_v20 = vmul.f32 %v127_v17, %v62_v19 }
   0xe   :  { %v64_v21 = vadd.f32 %v127_v17, %v63_v20 }
  0x10   :  { %v66_v22 = vsel %vm65_vm1, %v127_v17, %v64_v21 }
  0x88   :  { %v47_v10 = vpop.f32.mrf.mxu0 }
  0x89   :  { %v48_v11 = vadd.f32 %v123_v9, %v47_v10 }
  0x8b   :  { %v54_v12 = vsel %vm34_vm0, %v48_v11, 0.0 }
  0x8c   :  { %55 = vadd.xlane.f32.xlu0 %v54_v12 }
  0x90   :  { %v49_v13 = vpop.f32.mrf.mxu0 }
  0x91   :  { %v50_v14 = vadd.f32 %v123_v9, %v49_v13 }
  0x93   :  { %v57_v15 = vsel %vm34_vm0, %v50_v14, 0.0 }
  0x94   :  { %58 = vadd.xlane.f32.xlu0 %v57_v15 }
  0xff   :  { %v56_v23 = vpop.xlane.xlu0 %55 }
 0x100   :  { %v67_v24 = vmul.f32 %v66_v22, %v56_v23 }
 0x102   :  { %v69_v25 = vsub.f32 %v48_v11, %v67_v24 }
 0x104   :  { %v71_v26 = vmul.f32 %v69_v25, %v69_v25 }
 0x106   :  { %v73_v27 = vsel %vm34_vm0, %v71_v26, 0.0 }
 0x107   :  { %74 = vadd.xlane.f32.xlu1 %v73_v27  ;;  %v59_v28 = vpop.xlane.xlu0 %58 }
 0x108   :  { %v68_v29 = vmul.f32 %v66_v22, %v59_v28 }
 0x10a   :  { %v70_v30 = vsub.f32 %v50_v14, %v68_v29 }
 0x10c   :  { %v72_v31 = vmul.f32 %v70_v30, %v70_v30 }
 0x10e   :  { %v76_v32 = vsel %vm34_vm0, %v72_v31, 0.0 }
 0x10f   :  { %77 = vadd.xlane.f32.xlu1 %v76_v32 }
 0x17a   :  { %v75_v33 = vpop.xlane.xlu1 %74 }
 0x17b   :  { %v79_v34 = vmul.f32 %v75_v33, %v66_v22 }
 0x17d   :  { %v81_v35 = vadd.f32 1e-06, %v79_v34 }
 0x17f   :  { %128 = vrsqrt.f32 %v81_v35  ;;  %vm89_vm3 = vweird.f32 %v81_v35 }
 0x182   :  { %v78_v36 = vpop.xlane.xlu1 %77 }
 0x183   :  { %v80_v37 = vmul.f32 %v78_v36, %v66_v22 }
 0x185   :  { %v129_v38 = vpop.eup %128  ;;  %v82_v39 = vadd.f32 1e-06, %v80_v37 }
 0x186   :  { %v84_v40 = vmul.f32 %v129_v38, %v81_v35  ;;  %vm90_vm2 = vweird.f32 %v129_v38 }
 0x187   :  { %130 = vrsqrt.f32 %v82_v39  ;;  %vm91_vm4 = vmor %vm89_vm3, %vm90_vm2  ;;  %vm99_vm6 = vweird.f32 %v82_v39 }
 0x188   :  { %v85_v41 = vmul.f32 %v129_v38, %v84_v40 }
 0x18a   :  { %v86_v42 = vmul.f32 0.5, %v85_v41 }
 0x18c   :  { %v87_v43 = vsub.f32 1.5, %v86_v42 }
 0x18d   :  { %v131_v44 = vpop.eup %130 }
 0x18e   :  { %v88_v45 = vmul.f32 %v129_v38, %v87_v43  ;;  %v94_v46 = vmul.f32 %v131_v44, %v82_v39  ;;  %vm100_vm5 = vweird.f32 %v131_v44 }
 0x18f   :  { %vm101_vm7 = vmor %vm99_vm6, %vm100_vm5 }
 0x190   :  { %v92_v48 = vsel %vm91_vm4, %v129_v38, %v88_v45  ;;  %v95_v49 = vmul.f32 %v131_v44, %v94_v46 }
 0x191   :  { %v103_v51 = vmul.f32 %v92_v48, %v69_v25 }
 0x192   :  { %v96_v52 = vmul.f32 0.5, %v95_v49 }
 0x193   :  { %v108_v53 = vmul.f32 %v124_v47, %v103_v51 }
 0x194   :  { %v97_v54 = vsub.f32 1.5, %v96_v52 }
 0x195   :  { %v113_v55 = vadd.f32 %v125_v50, %v108_v53 }
 0x196   :  { %v98_v56 = vmul.f32 %v131_v44, %v97_v54 }
 0x197   :  { %115 = vst.msk [vmem:[%s208_s5] sm:$0xff] %vm34_vm0, %v113_v55 }
 0x198   :  { %v102_v57 = vsel %vm101_vm7, %v131_v44, %v98_v56 }
 0x199   :  { %v104_v58 = vmul.f32 %v102_v57, %v70_v30 }
 0x19b   :  { %v109_v59 = vmul.f32 %v124_v47, %v104_v58 }
 0x19d   :  { %v114_v60 = vadd.f32 %v125_v50, %v109_v59 }
 0x19f   :  { %116 = vst.msk [vmem:[%s208_s5 + $0x8] sm:$0xff] %vm34_vm0, %v114_v60 }

// kernel: sum_cap_encoder_forward.5
= control target key start
LH: loop header
LB: loop body
LE: loop exit
PB: predicated region body
PF: predicated region fallthrough
CT: control target
= control target key end

     0   :  { %s1713_s0 = inlined_call_operand.vmem [shape: f32[2,8,32], index: 0, kind: input, shape index: {}]   ;;  %s1714_s1 = inlined_call_operand.vmem [shape: f32[2,32,16], index: 1, kind: input, shape index: {}]   ;;  %s1715_s2 = inlined_call_operand.vmem [shape: f32[2,1,16], index: 2, kind: input, shape index: {}]   ;;  %s1716_s3 = inlined_call_operand.vmem [shape: f32[2,32,16], index: 3, kind: input, shape index: {}]   ;;  %s1717_s4 = inlined_call_operand.vmem [shape: f32[2,1,16], index: 4, kind: input, shape index: {}]   ;;  %s1718_s5 = inlined_call_operand.vmem [shape: f32[2,32,16], index: 5, kind: input, shape index: {}]   ;;  %s1719_s6 = inlined_call_operand.vmem [shape: f32[2,1,16], index: 6, kind: input, shape index: {}]   ;;  %s1720_s7 = inlined_call_operand.vmem [shape: f32[2,16,32], index: 7, kind: input, shape index: {}]   ;;  %s1721_s8 = inlined_call_operand.vmem [shape: f32[1,32], index: 8, kind: input, shape index: {}]   ;;  %s1722_s9 = inlined_call_operand.vmem [shape: f32[1,32], index: 9, kind: input, shape index: {}]   ;;  %s1723_s10 = inlined_call_operand.vmem [shape: f32[1,32], index: 10, kind: input, shape index: {}]   ;;  %s1724_s11 = inlined_call_operand.vmem [shape: f32[32,64], index: 11, kind: input, shape index: {}]   ;;  %s1725_s12 = inlined_call_operand.vmem [shape: f32[1,64], index: 12, kind: input, shape index: {}]   ;;  %s1726_s13 = inlined_call_operand.vmem [shape: f32[64,32], index: 13, kind: input, shape index: {}]   ;;  %s1727_s14 = inlined_call_operand.vmem [shape: f32[1,32], index: 14, kind: input, shape index: {}]   ;;  %s1728_s15 = inlined_call_operand.vmem [shape: f32[1,32], index: 15, kind: input, shape index: {}]   ;;  %s1729_s16 = inlined_call_operand.vmem [shape: f32[1,32], index: 16, kind: input, shape index: {}]   ;;  %s1730_s17 = inlined_call_operand.hbm [shape: f32[2,8,32], index: 17, kind: output, shape index: {0}]   ;;  %s1731_s18 = inlined_call_operand.vmem [shape: f32[2,8,32], index: 18, kind: output, shape index: {1}]  }
   0x1   :  { %1741 = sst [smem:[#allocation11_spill]] %s1713_s0 }
   0x2   :  { %1742 = sst [smem:[#allocation12_spill]] %s1714_s1 }
   0x3   :  { %1743 = sst [smem:[#allocation13_spill]] %s1715_s2 }
   0x4   :  { %1744 = sst [smem:[#allocation14_spill]] %s1716_s3 }
   0x5   :  { %1745 = sst [smem:[#allocation15_spill]] %s1717_s4 }
   0x6   :  { %1746 = sst [smem:[#allocation16_spill]] %s1718_s5 }
   0x7   :  { %1747 = sst [smem:[#allocation17_spill]] %s1729_s16 }
   0x8   :  { %1748 = sst [smem:[#allocation18_spill]] %s1731_s18 }
   0x9   :  { %24 = vsyncpa [#allocation3], 0 }
   0xa   :  { %26 = vsyncpa [#allocation3 + $0x1], 0  ;;  %s1402_s27 = smov 0   ;;  %s1404_s28 = smov 0  }
   0xb   :  { %s1406_s29 = smov 0   ;;  %s1408_s30 = smov 0  }
   0xc LB: > { %1749 = sst [smem:[#allocation5_spill]] %s1292_s27  ;;  %s1423_s0 = sadd.s32 4294967295, %s1304_s30   ;;  %s1304_s30 = sphi %s1408_s30, %s1769_s30   ;;  %s1300_s29 = sphi %s1406_s29, %s1774_s29   ;;  %s1296_s28 = sphi %s1404_s28, %s1773_s28   ;;  %s1292_s27 = sphi %s1402_s27, %s1772_s27  }
   0xd   : > { %1750 = sst [smem:[#allocation6_spill]] %s1300_s29  ;;  %s1133_s19 = sadd.s32 4294967294, %s1304_s30  }
   0xe   : > { %1751 = sst [smem:[#allocation7_spill]] %s1304_s30  ;;  %s1427_s1 = sadd.s32 1, %s1304_s30  }
   0xf   : > { %1752 = sst [smem:[#allocation8_spill]] %s1427_s1  ;;  %s401_s20 = sadd.s32 1, %s1300_s29 }
  0x10   : > { %s398_s21 = ssub.s32 %s1304_s30, %s1427_s1  ;;  %p411_p0 = scmp.ne.s32.totalorder %s1300_s29, %s1296_s28 }
  0x11   : > { %p399_p1 = scmp.eq.s32.totalorder %s398_s21, 0  ;;  %p412_p2 = scmp.eq.s32.totalorder %s1423_s0, 1 }
  0x12   : > { %p417_p3 = scmp.ne.s32.totalorder %s1296_s28, %s1292_s27  ;;  %p418_p4 = scmp.eq.s32.totalorder %s1133_s19, 1 }
  0x13   : > { %s1438_s22 = scalar_select %p399_p1, %s1300_s29, %s401_s20  }
  0x14   : > { %p1440_p5 = por %p412_p2, %p411_p0  ;;  %p1444_p6 = por %p418_p4, %p417_p3 }
  0x15   : > { %1753 = sst [smem:[#allocation9_spill]] %s1438_s22  ;;  %p1136_p7 = scmp.ge.s32.totalorder %s1304_s30, 1 }
  0x16   : > { %s1755_s23 = scalar_select %p1444_p6, 1, 0 }
  0x17   : > { %p517_p8 = scmp.lt.s32.totalorder %s1304_s30, 3 }
  0x18   : > { %1756 = sst [smem:[#allocation10_spill]] %s1755_s23 }
  0x19   : > { %p518_p9 = pnand %p1136_p7, %p517_p8 }
  0x1a   : > { %s1757_s26 = sld [smem:[#allocation12_spill]] (!%p518_p9)  ;;  %p574_p10 = scmp.lt.s32.totalorder (!%p518_p9), %s1423_s0, 1 }
  0x1b   : > { %521 = sbr.rel (%p518_p9) target bundleno = 2038 (0x7f6), region = 88  ;;  %s1758_s3 = sld [smem:[#allocation14_spill]] (!%p518_p9) }
  0x1c   : > { %s1759_s23 = sld [smem:[#allocation11_spill]] (!%p518_p9)  ;;  %s565_s25 = sand.u32 (!%p518_p9), 1, %s1296_s28  }
  0x1d   : > { %s1760_s4 = sld [smem:[#allocation15_spill]] (!%p518_p9)  ;;  %s1643_s20 = sshll.u32 (!%p518_p9), %s565_s25, 3 }
  0x1e   : > { %s1761_s21 = sld [smem:[#allocation13_spill]] (!%p518_p9)  ;;  %s567_s22 = scalar_lea.vmem (!%p518_p9), [#allocation2], %s1643_s20 }
  0x1f   : > { %s1762_s5 = sld [smem:[#allocation16_spill]] (!%p518_p9)  ;;  %s1172_s29 = sshll.u32 (!%p518_p9), %s1423_s0, 3 }
  0x20   : > { %v587_v0 = vld [vmem:[%s1757_s26 + $0x10] sm:$0xff]  ;;  %v588_v1 = vld [vmem:[%s1757_s26 + $0x18] sm:$0xff]  ;;  %v585_v5 = vld [vmem:[%s1757_s26] sm:$0xff]  ;;  %s1476_s30 = scalar_select %p574_p10, %s1423_s0, 1  ;;  %vm595_vm0 = vcmask 261120   ;;  %vm660_vm1 = vcmask 130048  }
  0x21   : > { %v614_v2 = vld [vmem:[%s1758_s3 + $0x10] sm:$0xff]  ;;  %v590_v3 = vpack.c.bf16 %v588_v1, %v587_v0  ;;  %v615_v4 = vld [vmem:[%s1758_s3 + $0x18] sm:$0xff]  ;;  %v586_v6 = vld [vmem:[%s1757_s26 + $0x8] sm:$0xff]  ;;  %vm681_vm2 = vcmask 64512   ;;  %vm698_vm3 = vcmask 1043456   ;;  %vm976_vm8 = vcmask 523264  }
  0x22   : > { %v617_v7 = vpack.c.bf16 %v615_v4, %v614_v2  ;;  %v612_v8 = vld [vmem:[%s1758_s3] sm:$0xff]  ;;  %v613_v9 = vld [vmem:[%s1758_s3 + $0x8] sm:$0xff]  ;;  %v589_v10 = vpack.c.bf16 %v586_v6, %v585_v5  ;;  %s1740_s27 = sshll.u32 %s1476_s30, 3  ;;  %v1153_v30 = vld [vmem:[%s1758_s3 + $0x30] sm:$0xff]  ;;  %s1044_s16 = sshll.u32 %s567_s22, 4  ;;  %s1045_s16 = int_to_ptr.vmem [resolvable:$true] %s1044_s16 }
  0x23   : > { %605 = vmatpush.bf16.msra.mxu0 %v590_v3  ;;  %v616_v11 = vpack.c.bf16 %v613_v9, %v612_v8  ;;  %s577_s24 = scalar_lea.vmem %s1759_s23, %s1740_s27  ;;  %v1216_v14 = vld [vmem:[%s1760_s4] ss:$0 sm:$0xff]  ;;  %v1154_v31 = vld [vmem:[%s1758_s3 + $0x38] sm:$0xff]  ;;  %v1152_v35 = vld [vmem:[%s1758_s3 + $0x28] sm:$0xff]  ;;  %s1028_s27 = scalar_lea.sflag [#allocation3], %s565_s25 }
  0x24   : > { %628 = vmatpush.bf16.msra.mxu1 %v617_v7  ;;  %v1484_v12 = vld [vmem:[%s577_s24] sm:$0xff]  ;;  %v750_v33 = vpack.c.bf16 %v1154_v31, %v1153_v30  ;;  %v1147_v41 = vld [vmem:[%s1757_s26 + $0x30] sm:$0xff]  ;;  %v1148_v42 = vld [vmem:[%s1757_s26 + $0x38] sm:$0xff]  ;;  %s1042_s24 = scalar_lea.hbm %s1730_s17, %s1172_s29 }
  0x25   : > { %v1488_v13 = vpack.c.bf16 %v1484_v12, %v1484_v12  ;;  %v1215_v17 = vld [vmem:[%s1761_s21] ss:$0 sm:$0xff]  ;;  %v637_v25 = vld [vmem:[%s1762_s5 + $0x10] sm:$0xff]  ;;  %v638_v26 = vld [vmem:[%s1762_s5 + $0x18] sm:$0xff]  ;;  %v725_v43 = vpack.c.bf16 %v1148_v42, %v1147_v41  ;;  %s1046_s18 = sshll.u32 %s1042_s24, 4  ;;  %s1047_s18 = int_to_ptr.hbm [resolvable:$true] %s1046_s18 }
  0x26   : > { %v635_v27 = vld [vmem:[%s1762_s5] sm:$0xff]  ;;  %v640_v28 = vpack.c.bf16 %v638_v26, %v637_v25  ;;  %v636_v29 = vld [vmem:[%s1762_s5 + $0x8] sm:$0xff]  ;;  %v1159_v2 = vld [vmem:[%s1762_s5 + $0x30] sm:$0xff]  ;;  %s1256_s19 = sshra.s32 %s1047_s18, 4  ;;  %s1257_s19 = int_to_ptr.hbm [resolvable:$true] %s1256_s19 }
  0x27   : > { %606 = vmatpush.bf16.msra.mxu0 %v589_v10  ;;  %v639_v32 = vpack.c.bf16 %v636_v29, %v635_v27  ;;  %v1151_v34 = vld [vmem:[%s1758_s3 + $0x20] sm:$0xff]  ;;  %v1146_v45 = vld [vmem:[%s1757_s26 + $0x28] sm:$0xff]  ;;  %v1160_v3 = vld [vmem:[%s1762_s5 + $0x38] sm:$0xff]  ;;  %s1258_s3 = scalar_lea.hbm %s1257_s19, 8  ;;  %p1263_p0 = scmp.lt.s32.totalorder %s1257_s19, %s1730_s17 }
  0x28   : > { %629 = vmatpush.bf16.msra.mxu1 %v616_v11  ;;  %651 = vmatpush.bf16.msra.mxu2 %v640_v28  ;;  %v749_v36 = vpack.c.bf16 %v1152_v35, %v1151_v34  ;;  %v1145_v44 = vld [vmem:[%s1757_s26 + $0x20] sm:$0xff]  ;;  %v775_v5 = vpack.c.bf16 %v1160_v3, %v1159_v2  ;;  %v1158_v6 = vld [vmem:[%s1762_s5 + $0x28] sm:$0xff]  ;;  %v934_v3 = vld [vmem:[%s1724_s11 + $0x10] sm:$0xff]  ;;  %p1259_p11 = scmp.ne.s32.totalorder %s1257_s19, %s1258_s3 }
  0x29   : > { %v724_v46 = vpack.c.bf16 %v1146_v45, %v1145_v44  ;;  %v1217_v47 = vld [vmem:[%s1719_s6] ss:$0 sm:$0xff]  ;;  %v1218_v57 = vld [vmem:[%s1760_s4 + $0x1] ss:$0 sm:$0xff] }
  0x2a   : > { %1140 = vmatmul.msk.bf16.vlgmr.msra.gmra.mxu0 %vm595_vm0, %v1488_v13  ;;  %v1157_v4 = vld [vmem:[%s1762_s5 + $0x20] sm:$0xff]  ;;  %p1260_p12 = pnand %p1259_p11, %p1440_p5  ;;  %s1262_s5 = scalar_lea.hbm %s1730_s17, 16 }
  0x2b   : > { %1141 = vmatmul.msk.bf16.vlgmr.msra.gmra.mxu1 %vm595_vm0, %v1488_v13  ;;  %v774_v7 = vpack.c.bf16 %v1158_v6, %v1157_v4  ;;  %v935_v4 = vld [vmem:[%s1724_s11 + $0x18] sm:$0xff]  ;;  %v932_v6 = vld [vmem:[%s1724_s11] sm:$0xff]  ;;  %p1264_p1 = scmp.lt.s32.totalorder %s1262_s5, %s1258_s3 }
  0x2c   : > { %652 = vmatpush.bf16.msra.mxu2 %v639_v32  ;;  %737 = vmatpush.bf16.msrb.mxu1 %v725_v43  ;;  %p1261_p13 = pneg %p1260_p12 }
  0x2d   : > { %p1265_p2 = por %p1264_p1, %p1263_p0 }
  0x2f   : > { %1142 = vmatmul.msk.bf16.vlgmr.msra.gmra.mxu2 %vm595_vm0, %v1488_v13  ;;  %p1266_p3 = pnand %p1265_p2, %p1261_p13 }
  0x30   : > { %762 = vmatpush.bf16.msrb.mxu2 %v750_v33  ;;  %738 = vmatpush.bf16.msrb.mxu1 %v724_v46 }
  0x34   : > { %763 = vmatpush.bf16.msrb.mxu2 %v749_v36 }
  0x3b   : > { %1150 = vmatmul.msk.bf16.vlgmr.msrb.gmra.mxu1 %vm595_vm0, %v1488_v13 }
  0x3f   : > { %1156 = vmatmul.msk.bf16.vlgmr.msrb.gmra.mxu2 %vm595_vm0, %v1488_v13 }
  0xa7   : > { %v608_v15 = vpop.f32.mrf.mxu0 }
  0xa8   : > { %v631_v16 = vpop.f32.mrf.mxu1  ;;  %v609_v20 = vadd.f32 %v1215_v17, %v608_v15  ;;  %v716_v17 = vld [vmem:[%s1720_s7] sm:$0xff] }
  0xa9   : > { %v632_v18 = vadd.f32 %v1216_v14, %v631_v16  ;;  %v1219_v14 = vld [vmem:[%s1761_s21 + $0x1] ss:$0 sm:$0xff] }
  0xaa   : > { %v658_v24 = vpack.c.bf16 %v609_v20, %v609_v20 }
  0xab   : > { %v659_v19 = vpack.c.bf16 %v632_v18, %v632_v18 }
  0xad   : > { %v665_v21 = vsel %vm660_vm1, %v659_v19, 0  ;;  %v1220_v19 = vld [vmem:[%s1719_s6 + $0x1] ss:$0 sm:$0xff] }
  0xae   : > { %674 = vmatpush.bf16.xpose.msra.mxu3 %v665_v21 }
  0xaf   : > { %v610_v22 = vpop.f32.mrf.mxu0 }
  0xb0   : > { %v633_v23 = vpop.f32.mrf.mxu1 }
  0xb2   : > { %v654_v48 = vpop.f32.mrf.mxu2 }
  0xb3   : > { %v655_v49 = vadd.f32 %v1217_v47, %v654_v48 }
  0xb5   : > { %1143 = vmatmul.msk.bf16.vlgmr.msra.gmra.mxu3 %vm660_vm1, %v658_v24  ;;  %v694_v52 = vpack.c.bf16 %v655_v49, %v655_v49  ;;  %v1221_v49 = vld [vmem:[%s1721_s8] ss:$0 sm:$0xff] }
  0xb6   : > { %787 = vmatpush.bf16.msrb.mxu3 %v775_v5  ;;  %v937_v5 = vpack.c.bf16 %v935_v4, %v934_v3 }
  0xb7   : > { %v700_v54 = vsel %vm698_vm3, %v694_v52, 0 }
  0xb8   : > { %709 = vmatpush.bf16.msrb.mxu0 %v700_v54  ;;  %v740_v0 = vpop.f32.mrf.mxu1 }
  0xb9   : > { %v741_v15 = vadd.f32 %v1219_v14, %v740_v0 }
  0xba   : > { %v656_v55 = vpop.f32.mrf.mxu2  ;;  %788 = vmatpush.bf16.msrb.mxu3 %v774_v7  ;;  %v933_v7 = vld [vmem:[%s1724_s11 + $0x8] sm:$0xff] }
  0xbb   : > { %v794_v16 = vpack.c.bf16 %v741_v15, %v741_v15 }
  0xc0   : > { %v742_v1 = vpop.f32.mrf.mxu1 }
  0xc2   : > { %v765_v59 = vpop.f32.mrf.mxu2 }
  0xc3   : > { %v766_v60 = vadd.f32 %v1218_v57, %v765_v59 }
  0xc5   : > { %v795_v61 = vpack.c.bf16 %v766_v60, %v766_v60  ;;  %1162 = vmatmul.msk.bf16.vlgmr.msrb.gmra.mxu3 %vm595_vm0, %v1488_v13  ;;  %v717_v13 = vld [vmem:[%s1720_s7 + $0x8] sm:$0xff] }
  0xc6   : > { %v718_v18 = vpack.c.bf16 %v717_v13, %v716_v17 }
  0xc7   : > { %v800_v62 = vsel %vm660_vm1, %v795_v61, 0 }
  0xc8   : > { %809 = vmatpush.bf16.xpose.msra.mxu0 %v800_v62  ;;  %879 = vmatpush.bf16.msra.mxu3 %v718_v18 }
  0xca   : > { %v767_v63 = vpop.f32.mrf.mxu2 }
 0x138   : > { %v676_v37 = vpop.f32.mrf.mxu3 }
 0x139   : > { %v680_v38 = vmul.f32 0.25, %v676_v37 }
 0x13b   : > { %v682_v39 = vsel %vm681_vm2, %v680_v38, -inf }
 0x13c   : > { %683 = vmax.xlane.f32.xlu0 %v682_v39  ;;  %v1165_v39 = vld [vmem:[%s1720_s7 + $0x10] sm:$0xff] }
 0x140   : > { %v678_v40 = vpop.f32.mrf.mxu3 }
 0x141   : > { %v1166_v40 = vld [vmem:[%s1720_s7 + $0x18] sm:$0xff] }
 0x142   : > { %v852_v41 = vpack.c.bf16 %v1166_v40, %v1165_v39 }
 0x144   : > { %863 = vmatpush.bf16.msra.mxu2 %v852_v41 }
 0x148   : > { %v790_v21 = vpop.f32.mrf.mxu3 }
 0x149   : > { %v791_v23 = vadd.f32 %v1220_v19, %v790_v21  ;;  %v962_v19 = vld [vmem:[%s1726_s13 + $0x10] sm:$0xff] }
 0x14b   : > { %v828_v24 = vpack.c.bf16 %v791_v23, %v791_v23 }
 0x14d   : > { %v833_v25 = vsel %vm698_vm3, %v828_v24, 0 }
 0x14e   : > { %842 = vmatpush.bf16.msra.mxu1 %v833_v25 }
 0x150   : > { %v792_v27 = vpop.f32.mrf.mxu3 }
 0x1af   : > { %v684_v50 = vpop.xlane.xlu0 %683 }
 0x1b0   : > { %v685_v51 = vsub.f32 %v680_v38, %v684_v50 }
 0x1b2   : > { %v686_v53 = vmul.f32 1.442695, %v685_v51 }
 0x1b4   : > { %1228 = vpow2.f32 %v686_v53 }
 0x1ba   : > { %v1229_v56 = vpop.eup %1228 }
 0x1bb   : > { %v688_v58 = vsel %vm681_vm2, %v1229_v56, 0.0 }
 0x1bc   : > { %689 = vadd.xlane.f32.xlu0 %v688_v58 }
 0x22f   : > { %v690_v8 = vpop.xlane.xlu0 %689 }
 0x230   : > { %1230 = vrcp.f32 %v690_v8  ;;  %v936_v8 = vpack.c.bf16 %v933_v7, %v932_v6 }
 0x236   : > { %v1231_v9 = vpop.eup %1230 }
 0x237   : > { %v692_v10 = vmul.f32 %v1231_v9, %v1229_v56  ;;  %v1306_v56 = vmov 32.0   ;;  %v966_v9 = vld [vmem:[%s1726_s13 + $0x30] sm:$0xff] }
 0x239   : > { %v693_v11 = vpack.c.bf16 %v692_v10, %v692_v10  ;;  %v967_v10 = vld [vmem:[%s1726_s13 + $0x38] sm:$0xff] }
 0x23a   : > { %v971_v15 = vpack.c.bf16 %v967_v10, %v966_v9 }
 0x23b   : > { %1144 = vmatmul.msk.bf16.vlgmr.msrb.gmra.mxu0 %vm681_vm2, %v693_v11  ;;  %v964_v11 = vld [vmem:[%s1726_s13 + $0x20] sm:$0xff] }
 0x23c   : > { %951 = vmatpush.bf16.msrb.mxu0 %v937_v5  ;;  %984 = vmatpush.bf16.msrb.mxu1 %v971_v15 }
 0x240   : > { %952 = vmatpush.bf16.msrb.mxu0 %v936_v8 }
 0x24b   : > { %1163 = vmatmul.msk.bf16.vlgmr.msra.gmra.mxu0 %vm660_vm1, %v794_v16  ;;  %v965_v16 = vld [vmem:[%s1726_s13 + $0x28] sm:$0xff] }
 0x24c   : > { %v970_v13 = vpack.c.bf16 %v965_v16, %v964_v11 }
 0x24e   : > { %985 = vmatpush.bf16.msrb.mxu1 %v970_v13 }
 0x2b8   : > { %v711_v20 = vpop.f32.mrf.mxu0 }
 0x2b9   : > { %v715_v22 = vpack.c.bf16 %v711_v20, %v711_v20  ;;  %v963_v20 = vld [vmem:[%s1726_s13 + $0x18] sm:$0xff] }
 0x2ba   : > { %v969_v21 = vpack.c.bf16 %v963_v20, %v962_v19 }
 0x2bb   : > { %1168 = vmatmul.msk.bf16.vlgmr.msra.gmra.mxu3 %vm660_vm1, %v715_v22 }
 0x2bc   : > { %986 = vmatpush.bf16.msrb.mxu1 %v969_v21 }
 0x2c0   : > { %v713_v26 = vpop.f32.mrf.mxu0 }
 0x2c8   : > { %v811_v28 = vpop.f32.mrf.mxu0 }
 0x2c9   : > { %v815_v29 = vmul.f32 0.25, %v811_v28  ;;  %v1222_v28 = vld [vmem:[%s1722_s9] ss:$0 sm:$0xff] }
 0x2cb   : > { %v816_v30 = vsel %vm681_vm2, %v815_v29, -inf }
 0x2cc   : > { %817 = vmax.xlane.f32.xlu1 %v816_v30  ;;  %v1223_v30 = vld [vmem:[%s1723_s10] ss:$0 sm:$0xff] }
 0x2d0   : > { %v813_v31 = vpop.f32.mrf.mxu0 }
 0x33e   : > { %v881_v32 = vpop.f32.mrf.mxu3 }
 0x33f   : > { %v818_v33 = vpop.xlane.xlu1 %817 }
 0x340   : > { %v819_v34 = vsub.f32 %v815_v29, %v818_v33 }
 0x342   : > { %v820_v35 = vmul.f32 1.442695, %v819_v34 }
 0x344   : > { %1232 = vpow2.f32 %v820_v35  ;;  %v960_v35 = vld [vmem:[%s1726_s13] sm:$0xff] }
 0x346   : > { %v883_v36 = vpop.f32.mrf.mxu3 }
 0x347   : > { %v961_v36 = vld [vmem:[%s1726_s13 + $0x8] sm:$0xff] }
 0x34a   : > { %v1233_v37 = vpop.eup %1232 }
 0x34b   : > { %v822_v38 = vsel %vm681_vm2, %v1233_v37, 0.0 }
 0x34c   : > { %823 = vadd.xlane.f32.xlu1 %v822_v38  ;;  %v1224_v38 = vld [vmem:[%s1725_s12] ss:$0 sm:$0xff] }
 0x3bf   : > { %v824_v42 = vpop.xlane.xlu1 %823 }
 0x3c0   : > { %1234 = vrcp.f32 %v824_v42 }
 0x3c1   : > { %1236 = vrcp.f32 %v1306_v56 }
 0x3c6   : > { %v1235_v43 = vpop.eup %1234 }
 0x3c7   : > { %v826_v44 = vmul.f32 %v1235_v43, %v1233_v37  ;;  %v1237_v57 = vpop.eup %1236  ;;  %v968_v37 = vpack.c.bf16 %v961_v36, %v960_v35 }
 0x3c8   : > { %v897_v58 = vmul.f32 32.0, %v1237_v57  ;;  %vm901_vm4 = vweird.f32 %v1237_v57 }
 0x3c9   : > { %v827_v45 = vpack.c.bf16 %v826_v44, %v826_v44  ;;  %987 = vmatpush.bf16.msrb.mxu1 %v968_v37  ;;  %v1225_v44 = vld [vmem:[%s1727_s14] ss:$0 sm:$0xff] }
 0x3ca   : > { %v898_v59 = vsub.f32 1.0, %v897_v58 }
 0x3cb   : > { %1164 = vmatmul.msk.bf16.vlgmr.msra.gmra.mxu1 %vm681_vm2, %v827_v45 }
 0x3cc   : > { %v899_v60 = vmul.f32 %v1237_v57, %v898_v59 }
 0x3ce   : > { %v900_v61 = vadd.f32 %v1237_v57, %v899_v60 }
 0x3d0   : > { %v1599_v62 = vsel %vm901_vm4, %v1237_v57, %v900_v61 }
 0x448   : > { %v844_v46 = vpop.f32.mrf.mxu1 }
 0x449   : > { %v848_v47 = vpack.c.bf16 %v844_v46, %v844_v46 }
 0x44b   : > { %1167 = vmatmul.msk.bf16.vlgmr.msra.gmra.mxu2 %vm660_vm1, %v848_v47 }
 0x450   : > { %v846_v48 = vpop.f32.mrf.mxu1 }
 0x4ce   : > { %v865_v50 = vpop.f32.mrf.mxu2 }
 0x4cf   : > { %v882_v51 = vadd.f32 %v881_v32, %v865_v50 }
 0x4d1   : > { %v889_v52 = vadd.f32 %v1221_v49, %v882_v51 }
 0x4d3   : > { %v890_v53 = vadd.f32 %v889_v52, %v1484_v12 }
 0x4d5   : > { %v893_v54 = vsel %vm595_vm0, %v890_v53, 0.0 }
 0x4d6   : > { %894 = vadd.xlane.f32.xlu2 %v893_v54  ;;  %v867_v55 = vpop.f32.mrf.mxu2 }
 0x549   : > { %v895_v63 = vpop.xlane.xlu2 %894 }
 0x54a   : > { %v903_v0 = vmul.f32 %v1599_v62, %v895_v63 }
 0x54c   : > { %v904_v1 = vsub.f32 %v890_v53, %v903_v0 }
 0x54e   : > { %v905_v2 = vmul.f32 %v904_v1, %v904_v1 }
 0x550   : > { %v906_v12 = vsel %vm595_vm0, %v905_v2, 0.0 }
 0x551   : > { %907 = vadd.xlane.f32.xlu2 %v906_v12 }
 0x5c4   : > { %v908_v14 = vpop.xlane.xlu2 %907 }
 0x5c5   : > { %v909_v17 = vmul.f32 %v908_v14, %v1599_v62 }
 0x5c7   : > { %v910_v18 = vadd.f32 1e-06, %v909_v17 }
 0x5c9   : > { %1238 = vrsqrt.f32 %v910_v18  ;;  %vm917_vm6 = vweird.f32 %v910_v18 }
 0x5cf   : > { %v1239_v22 = vpop.eup %1238 }
 0x5d0   : > { %v912_v23 = vmul.f32 %v1239_v22, %v910_v18  ;;  %vm918_vm5 = vweird.f32 %v1239_v22 }
 0x5d1   : > { %vm919_vm7 = vmor %vm917_vm6, %vm918_vm5 }
 0x5d2   : > { %v913_v24 = vmul.f32 %v1239_v22, %v912_v23 }
 0x5d4   : > { %v914_v25 = vmul.f32 0.5, %v913_v24 }
 0x5d6   : > { %v915_v26 = vsub.f32 1.5, %v914_v25 }
 0x5d8   : > { %v916_v27 = vmul.f32 %v1239_v22, %v915_v26 }
 0x5da   : > { %v920_v29 = vsel %vm919_vm7, %v1239_v22, %v916_v27 }
 0x5db   : > { %v921_v31 = vmul.f32 %v920_v29, %v904_v1 }
 0x5dd   : > { %v925_v32 = vmul.f32 %v1222_v28, %v921_v31 }
 0x5df   : > { %v929_v33 = vadd.f32 %v1223_v30, %v925_v32 }
 0x5e1   : > { %v931_v34 = vpack.c.bf16 %v929_v33, %v929_v33  ;;  %930 = vst.msk [vmem:[%s567_s22] sm:$0xff] %vm595_vm0, %v929_v33 }
 0x5e3   : > { %1169 = vmatmul.msk.bf16.vlgmr.msrb.gmra.mxu0 %vm595_vm0, %v931_v34 }
 0x660   : > { %v954_v39 = vpop.f32.mrf.mxu0 }
 0x661   : > { %v955_v40 = vadd.f32 %v1224_v38, %v954_v39 }
 0x663   : > { %v958_v41 = vmax.f32 %v955_v40, 0.0 }
 0x665   : > { %v959_v42 = vpack.c.bf16 %v958_v41, %v958_v41 }
 0x667   : > { %1170 = vmatmul.msk.bf16.vlgmr.msrb.gmra.mxu1 %vm976_vm8, %v959_v42 }
 0x668   : > { %v956_v43 = vpop.f32.mrf.mxu0 }
 0x6e4   : > { %v989_v45 = vpop.f32.mrf.mxu1 }
 0x6e5   : > { %v990_v46 = vadd.f32 %v1225_v44, %v989_v45 }
 0x6e7   : > { %v993_v47 = vadd.f32 %v990_v46, %v929_v33 }
 0x6e9   : > { %v996_v48 = vsel %vm595_vm0, %v993_v47, 0.0 }
 0x6ea   : > { %997 = vadd.xlane.f32.xlu0 %v996_v48 }
 0x6ec   : > { %v991_v49 = vpop.f32.mrf.mxu1 }
 0x75d   : > { %v998_v50 = vpop.xlane.xlu0 %997 }
 0x75e   : > { %v999_v51 = vmul.f32 %v998_v50, %v1599_v62 }
 0x760   : > { %v1000_v52 = vsub.f32 %v993_v47, %v999_v51 }
 0x762   : > { %v1001_v53 = vmul.f32 %v1000_v52, %v1000_v52 }
 0x764   : > { %v1002_v54 = vsel %vm595_vm0, %v1001_v53, 0.0 }
 0x765   : > { %1003 = vadd.xlane.f32.xlu1 %v1002_v54 }
 0x766   : > { %1269 = shalt.err (!%p1266_p3)
}
 0x767   : > { %1175 = dma.vmem_to_hbm [thread:$0]  (%p1440_p5), %s1045_s16, 128, %s1047_s18, %s1028_s27   ;;  %v1226_v1 = vld [vmem:[%s1728_s15] ss:$0 sm:$0xff] }
 0x768   : > { %s1763_s25 = sld [smem:[#allocation17_spill]]  ;;  %s1764_s20 = sshll.u32 %s1476_s30, 3 }
 0x769   : > { %s1765_s24 = sld [smem:[#allocation18_spill]] }
 0x76f   : > { %s581_s16 = scalar_lea.vmem %s1765_s24, %s1764_s20 }
 0x7d8   : > { %v1004_v55 = vpop.xlane.xlu1 %1003 }
 0x7d9   : > { %v1005_v56 = vmul.f32 %v1004_v55, %v1599_v62  ;;  %v1227_v62 = vld [vmem:[%s1763_s25] ss:$0 sm:$0xff] }
 0x7db   : > { %v1006_v57 = vadd.f32 1e-06, %v1005_v56 }
 0x7dd   : > { %1240 = vrsqrt.f32 %v1006_v57  ;;  %vm1013_vm10 = vweird.f32 %v1006_v57 }
 0x7e3   : > { %v1241_v58 = vpop.eup %1240 }
 0x7e4   : > { %v1008_v59 = vmul.f32 %v1241_v58, %v1006_v57  ;;  %vm1014_vm9 = vweird.f32 %v1241_v58 }
 0x7e5   : > { %vm1015_vm11 = vmor %vm1013_vm10, %vm1014_vm9 }
 0x7e6   : > { %v1009_v60 = vmul.f32 %v1241_v58, %v1008_v59 }
 0x7e8   : > { %v1010_v61 = vmul.f32 0.5, %v1009_v60 }
 0x7ea   : > { %v1011_v63 = vsub.f32 1.5, %v1010_v61 }
 0x7ec   : > { %v1012_v0 = vmul.f32 %v1241_v58, %v1011_v63 }
 0x7ee   : > { %v1016_v2 = vsel %vm1015_vm11, %v1241_v58, %v1012_v0 }
 0x7ef   : > { %v1017_v12 = vmul.f32 %v1016_v2, %v1000_v52 }
 0x7f1   : > { %v1021_v3 = vmul.f32 %v1226_v1, %v1017_v12 }
 0x7f3   : > { %v1025_v4 = vadd.f32 %v1227_v62, %v1021_v3 }
 0x7f5   : > { %1026 = vst.msk [vmem:[%s581_s16] sm:$0xff] %vm595_vm0, %v1025_v4 }
 0x7f6 PF: > { %s1766_s18 = sld [smem:[#allocation7_spill]] }
 0x7f7   : > { %s1767_s27 = sld [smem:[#allocation5_spill]] }
 0x7fc   : > { %p1181_p4 = scmp.ge.s32.totalorder %s1766_s18, 2 }
 0x7fd   : > { %s1061_s0 = sand.u32 1, %s1767_s27  }
 0x7fe   : > { %p1178_p5 = pnand %p1181_p4, %p1444_p6  ;;  %s1062_s1 = scalar_lea.sflag [#allocation3], %s1061_s0 }
 0x800   : > { %p1179_p7 = pneg %p1178_p5 }
 0x802   : > { %1287 = dma.done.wait (%p1179_p7), %s1062_s1, 128  }
 0x803   : > { %1289 = vsyncadd (%p1179_p7), %s1062_s1, 4294967168  ;;  %s1769_s30 = sld [smem:[#allocation8_spill]]  ;;  %s1772_s27 = smov %s1296_s28 }
 0x804   : > { %s1770_s29 = sld [smem:[#allocation6_spill]] }
 0x805   : > { %s1771_s3 = sld [smem:[#allocation9_spill]] }
 0x809   : > { %p29_p8 = scmp.ge.s32.totalorder %s1769_s30, 4  }
 0x80a   : > { %s1773_s28 = smov %s1770_s29 }
 0x80b   : > { %s1774_s29 = smov %s1771_s3  ;;  %31 = sbr.rel (!%p29_p8) target bundleno = 12 (0xc), region = 142 }
 0x810   :  { %1075 = vsyncpa [#allocation3], 1 }
 0x811   :  { %1077 = vsyncpa [#allocation3 + $0x1], 1 }

// kernel: sum_cap_encoder_forward.7
= control target key start
LH: loop header
LB: loop body
LE: loop exit
PB: predicated region body
PF: predicated region fallthrough
CT: control target
= control target key end

     0   :  { %vm42_vm0 = vcmask 261120   ;;  %v126_v10 = vmov 0   ;;  %vm110_vm4 = vcmask 122880   ;;  %s200_s1 = inlined_call_operand.vmem [shape: f32[32,32], index: 1, kind: input, shape index: {}]   ;;  %s201_s3 = inlined_call_operand.vmem [shape: f32[1,32], index: 3, kind: input, shape index: {}]   ;;  %s202_s4 = inlined_call_operand.vmem [shape: f32[1,32], index: 4, kind: input, shape index: {}]   ;;  %s203_s0 = inlined_call_operand.vmem [shape: f32[16,32], index: 0, kind: input, shape index: {}]   ;;  %s204_s2 = inlined_call_operand.vmem [shape: f32[1,32], index: 2, kind: input, shape index: {}]   ;;  %s205_s6 = inlined_call_operand.<no memory space> [shape: f32[1,1], index: 6, kind: input, shape index: {}]   ;;  %s206_s5 = inlined_call_operand.vmem [shape: f32[1,32], index: 5, kind: input, shape index: {}]   ;;  %s207_s7 = inlined_call_operand.vmem [shape: f32[1,16], index: 7, kind: output, shape index: {}]  }
   0x1   :  { %v34_v0 = vld [vmem:[%s200_s1 + $0x10] sm:$0xff]  ;;  %v35_v1 = vld [vmem:[%s200_s1 + $0x18] sm:$0xff]  ;;  %v32_v2 = vld [vmem:[%s200_s1] sm:$0xff]  ;;  %v12_v9 = vstv %s205_s6  ;;  %120 = vset.pattern.permute.xlu0 %v126_v10 }
   0x2   :  { %v37_v3 = vpack.c.bf16 %v35_v1, %v34_v0  ;;  %v33_v4 = vld [vmem:[%s200_s1 + $0x8] sm:$0xff]  ;;  %v29_v6 = vld [vmem:[%s203_s0] sm:$0xff]  ;;  %13 = vst [vmem:[#allocation2] sm:$0x1] %v12_v9 }
   0x3   :  { %v36_v5 = vpack.c.bf16 %v33_v4, %v32_v2  ;;  %v30_v7 = vld [vmem:[%s203_s0 + $0x8] sm:$0xff]  ;;  %v121_v13 = vld [vmem:[%s204_s2] ss:$0 sm:$0xff] }
   0x4   :  { %52 = vmatpush.bf16.msra.mxu0 %v37_v3  ;;  %v31_v8 = vpack.c.bf16 %v30_v7, %v29_v6  ;;  %v62_v21 = vld [vmem:[%s206_s5] sm:$0x1] }
   0x5   :  { %v63_v22 = vpack.c.bf16 %v62_v21, %v62_v21 }
   0x8   :  { %53 = vmatpush.bf16.msra.mxu0 %v36_v5 }
   0x9   :  { %v65_v11 = vld [vmem:[#allocation2] sm:$0x1] }
   0xa   :  { %68 = vperm.xlu0 %120, %v65_v11  }
   0xb   :  { %116 = vmatmul.msk.bf16.vlgmr.msra.gmra.mxu0 %vm42_vm0, %v31_v8 }
  0x7c   :  { %v69_v23 = vpop.permute.xlu0 %68 }
  0x7d   :  { %v71_v24 = vperm.slane %v69_v23, 0 }
  0x88   :  { %v55_v12 = vpop.f32.mrf.mxu0 }
  0x89   :  { %v56_v14 = vadd.f32 %v121_v13, %v55_v12 }
  0x8b   :  { %v60_v17 = vmax.f32 %v56_v14, 0.0 }
  0x90   :  { %v57_v15 = vpop.f32.mrf.mxu0 }
  0x91   :  { %v58_v16 = vadd.f32 %v121_v13, %v57_v15 }
  0x93   :  { %v61_v18 = vmax.f32 %v58_v16, 0.0 }
  0x95   :  { %v64_v19 = vpack.c.bf16 %v61_v18, %v60_v17 }
  0x97   :  { %v76_v20 = vsel %vm42_vm0, %v64_v19, 0 }
  0x98   :  { %85 = vmatpush.bf16.xpose.msra.mxu1 %v76_v20 }
  0x9f   :  { %117 = vmatmul.msk.bf16.vlgmr.msra.gmra.mxu1 %vm42_vm0, %v63_v22 }
 0x11c   :  { %v87_v25 = vpop.f32.mrf.mxu1 }
 0x11d   :  { %v88_v26 = vadd.f32 %v87_v25, %v71_v24 }
 0x11f   :  { %v118_v27 = vmul.f32 -1.442695, %v88_v26 }
 0x121   :  { %122 = vpow2.f32 %v118_v27 }
 0x124   :  { %v89_v28 = vpop.f32.mrf.mxu1 }
 0x127   :  { %v123_v29 = vpop.eup %122 }
 0x128   :  { %v94_v30 = vadd.f32 1.0, %v123_v29 }
 0x12a   :  { %124 = vrcp.f32 %v94_v30  ;;  %v106_v34 = vand.u32 2147483648, %v94_v30  ;;  %v104_v36 = vand.u32 2147483647, %v94_v30  ;;  %vm100_vm2 = vweird.f32 %v94_v30 }
 0x12c   :  { %v107_v38 = vor.u32 1.1754944e-38, %v106_v34  ;;  %vm105_vm5 = vcmp.eq.f32.partialorder %v104_v36, 8.507059e+37 }
 0x130   :  { %v125_v31 = vpop.eup %124 }
 0x131   :  { %v96_v32 = vmul.f32 %v125_v31, %v94_v30  ;;  %vm101_vm1 = vweird.f32 %v125_v31 }
 0x132   :  { %vm102_vm3 = vmor %vm100_vm2, %vm101_vm1 }
 0x133   :  { %v97_v33 = vsub.f32 1.0, %v96_v32 }
 0x135   :  { %v98_v35 = vmul.f32 %v125_v31, %v97_v33 }
 0x137   :  { %v99_v37 = vadd.f32 %v125_v31, %v98_v35 }
 0x139   :  { %v103_v39 = vsel %vm102_vm3, %v125_v31, %v99_v37 }
 0x13a   :  { %v108_v40 = vsel %vm105_vm5, %v107_v38, %v103_v39 }
 0x13b   :  { %111 = vst.msk [vmem:[%s207_s7] sm:$0x1] %vm110_vm4, %v108_v40 }

// kernel: sum_cap_encoder_forward.6
= control target key start
LH: loop header
LB: loop body
LE: loop exit
PB: predicated region body
PF: predicated region fallthrough
CT: control target
= control target key end

     0   :  { %s1702_s0 = inlined_call_operand.vmem [shape: f32[2,8,32], index: 0, kind: input, shape index: {}]   ;;  %s1703_s1 = inlined_call_operand.vmem [shape: f32[2,32,16], index: 1, kind: input, shape index: {}]   ;;  %s1704_s2 = inlined_call_operand.vmem [shape: f32[2,1,16], index: 2, kind: input, shape index: {}]   ;;  %s1705_s3 = inlined_call_operand.vmem [shape: f32[2,32,16], index: 3, kind: input, shape index: {}]   ;;  %s1706_s4 = inlined_call_operand.vmem [shape: f32[2,1,16], index: 4, kind: input, shape index: {}]   ;;  %s1707_s5 = inlined_call_operand.vmem [shape: f32[2,32,16], index: 5, kind: input, shape index: {}]   ;;  %s1708_s6 = inlined_call_operand.vmem [shape: f32[2,1,16], index: 6, kind: input, shape index: {}]   ;;  %s1709_s7 = inlined_call_operand.vmem [shape: f32[2,16,32], index: 7, kind: input, shape index: {}]   ;;  %s1710_s8 = inlined_call_operand.vmem [shape: f32[1,32], index: 8, kind: input, shape index: {}]   ;;  %s1711_s9 = inlined_call_operand.vmem [shape: f32[1,32], index: 9, kind: input, shape index: {}]   ;;  %s1712_s10 = inlined_call_operand.vmem [shape: f32[1,32], index: 10, kind: input, shape index: {}]   ;;  %s1713_s11 = inlined_call_operand.vmem [shape: f32[32,64], index: 11, kind: input, shape index: {}]   ;;  %s1714_s12 = inlined_call_operand.vmem [shape: f32[1,64], index: 12, kind: input, shape index: {}]   ;;  %s1715_s13 = inlined_call_operand.vmem [shape: f32[64,32], index: 13, kind: input, shape index: {}]   ;;  %s1716_s14 = inlined_call_operand.vmem [shape: f32[1,32], index: 14, kind: input, shape index: {}]   ;;  %s1717_s15 = inlined_call_operand.vmem [shape: f32[1,32], index: 15, kind: input, shape index: {}]   ;;  %s1718_s16 = inlined_call_operand.vmem [shape: f32[1,32], index: 16, kind: input, shape index: {}]   ;;  %s1719_s17 = inlined_call_operand.vmem [shape: f32[2,8,32], index: 17, kind: output, shape index: {0}]   ;;  %s1720_s18 = inlined_call_operand.hbm [shape: f32[2,8,32], index: 18, kind: output, shape index: {1}]  }
   0x1   :  { %1732 = sst [smem:[#allocation12_spill]] %s1702_s0 }
   0x2   :  { %1733 = sst [smem:[#allocation13_spill]] %s1703_s1 }
   0x3   :  { %1734 = sst [smem:[#allocation14_spill]] %s1704_s2 }
   0x4   :  { %1735 = sst [smem:[#allocation15_spill]] %s1705_s3 }
   0x5   :  { %1736 = sst [smem:[#allocation16_spill]] %s1706_s4 }
   0x6   :  { %1737 = sst [smem:[#allocation17_spill]] %s1718_s16 }
   0x7   :  { %24 = vsyncpa [#allocation3], 0 }
   0x8   :  { %26 = vsyncpa [#allocation3 + $0x1], 0  ;;  %s1402_s27 = smov 0   ;;  %s1404_s28 = smov 0  }
   0x9   :  { %s1406_s29 = smov 0   ;;  %s1408_s30 = smov 0  }
   0xa LB: > { %1738 = sst [smem:[#allocation5_spill]] %s1292_s27  ;;  %s1423_s0 = sadd.s32 4294967295, %s1304_s30   ;;  %s1304_s30 = sphi %s1408_s30, %s1758_s30   ;;  %s1300_s29 = sphi %s1406_s29, %s1760_s29   ;;  %s1296_s28 = sphi %s1404_s28, %s1762_s28   ;;  %s1292_s27 = sphi %s1402_s27, %s1761_s27  }
   0xb   : > { %1739 = sst [smem:[#allocation6_spill]] %s1300_s29  ;;  %s1133_s19 = sadd.s32 4294967294, %s1304_s30  }
   0xc   : > { %1740 = sst [smem:[#allocation7_spill]] %s1304_s30  ;;  %s1427_s1 = sadd.s32 1, %s1304_s30  }
   0xd   : > { %1741 = sst [smem:[#allocation8_spill]] %s1427_s1  ;;  %s427_s20 = sadd.s32 1, %s1300_s29 }
   0xe   : > { %s424_s21 = ssub.s32 %s1304_s30, %s1427_s1  ;;  %p437_p0 = scmp.ne.s32.totalorder %s1300_s29, %s1296_s28 }
   0xf   : > { %p425_p1 = scmp.eq.s32.totalorder %s424_s21, 0  ;;  %p438_p2 = scmp.eq.s32.totalorder %s1423_s0, 1 }
  0x10   : > { %p443_p3 = scmp.ne.s32.totalorder %s1296_s28, %s1292_s27  ;;  %p444_p4 = scmp.eq.s32.totalorder %s1133_s19, 1 }
  0x11   : > { %s1438_s22 = scalar_select %p425_p1, %s1300_s29, %s427_s20  }
  0x12   : > { %p1440_p5 = por %p438_p2, %p437_p0  ;;  %p1444_p6 = por %p444_p4, %p443_p3 }
  0x13   : > { %1742 = sst [smem:[#allocation9_spill]] %s1438_s22  ;;  %p1136_p7 = scmp.ge.s32.totalorder %s1304_s30, 1 }
  0x14   : > { %s1743_s2 = scalar_select %p1440_p5, 1, 0 }
  0x15   : > { %s1745_s23 = scalar_select %p1444_p6, 1, 0 }
  0x16   : > { %1744 = sst [smem:[#allocation10_spill]] %s1743_s2  ;;  %p517_p8 = scmp.lt.s32.totalorder %s1304_s30, 3 }
  0x17   : > { %1746 = sst [smem:[#allocation11_spill]] %s1745_s23 }
  0x18   : > { %p518_p9 = pnand %p1136_p7, %p517_p8 }
  0x19   : > { %s1747_s26 = sld [smem:[#allocation13_spill]] (!%p518_p9)  ;;  %p574_p10 = scmp.lt.s32.totalorder (!%p518_p9), %s1423_s0, 1 }
  0x1a   : > { %521 = sbr.rel (%p518_p9) target bundleno = 2039 (0x7f7), region = 88  ;;  %s1748_s3 = sld [smem:[#allocation15_spill]] (!%p518_p9) }
  0x1b   : > { %s1749_s23 = sld [smem:[#allocation12_spill]] (!%p518_p9)  ;;  %s1172_s22 = sshll.u32 (!%p518_p9), %s1423_s0, 3 }
  0x1c   : > { %s1750_s4 = sld [smem:[#allocation16_spill]] (!%p518_p9)  ;;  %s1045_s25 = scalar_lea.hbm (!%p518_p9), %s1720_s18, %s1172_s22 }
  0x1d   : > { %s1751_s21 = sld [smem:[#allocation14_spill]] (!%p518_p9) }
  0x1f   : > { %v587_v0 = vld [vmem:[%s1747_s26 + $0x10] sm:$0xff]  ;;  %v588_v1 = vld [vmem:[%s1747_s26 + $0x18] sm:$0xff]  ;;  %v585_v5 = vld [vmem:[%s1747_s26] sm:$0xff]  ;;  %s1476_s30 = scalar_select %p574_p10, %s1423_s0, 1  ;;  %vm595_vm0 = vcmask 261120   ;;  %vm660_vm1 = vcmask 130048  }
  0x20   : > { %v614_v2 = vld [vmem:[%s1748_s3 + $0x10] sm:$0xff]  ;;  %v590_v3 = vpack.c.bf16 %v588_v1, %v587_v0  ;;  %v615_v4 = vld [vmem:[%s1748_s3 + $0x18] sm:$0xff]  ;;  %v586_v6 = vld [vmem:[%s1747_s26 + $0x8] sm:$0xff]  ;;  %vm681_vm2 = vcmask 64512   ;;  %vm698_vm3 = vcmask 1043456   ;;  %vm976_vm8 = vcmask 523264  }
  0x21   : > { %v617_v7 = vpack.c.bf16 %v615_v4, %v614_v2  ;;  %v612_v8 = vld [vmem:[%s1748_s3] sm:$0xff]  ;;  %v613_v9 = vld [vmem:[%s1748_s3 + $0x8] sm:$0xff]  ;;  %v589_v10 = vpack.c.bf16 %v586_v6, %v585_v5  ;;  %s1729_s27 = sshll.u32 %s1476_s30, 3  ;;  %v637_v25 = vld [vmem:[%s1707_s5 + $0x10] sm:$0xff]  ;;  %s1752_s19 = sshll.u32 %s1476_s30, 3 }
  0x22   : > { %605 = vmatpush.bf16.msra.mxu0 %v590_v3  ;;  %v616_v11 = vpack.c.bf16 %v613_v9, %v612_v8  ;;  %s577_s24 = scalar_lea.vmem %s1749_s23, %s1729_s27  ;;  %v1216_v14 = vld [vmem:[%s1750_s4] ss:$0 sm:$0xff]  ;;  %v638_v26 = vld [vmem:[%s1707_s5 + $0x18] sm:$0xff]  ;;  %v636_v29 = vld [vmem:[%s1707_s5 + $0x8] sm:$0xff]  ;;  %s581_s29 = scalar_lea.vmem %s1719_s17, %s1752_s19 }
  0x23   : > { %628 = vmatpush.bf16.msra.mxu1 %v617_v7  ;;  %v1484_v12 = vld [vmem:[%s577_s24] sm:$0xff]  ;;  %v640_v28 = vpack.c.bf16 %v638_v26, %v637_v25  ;;  %v1153_v30 = vld [vmem:[%s1748_s3 + $0x30] sm:$0xff]  ;;  %v1154_v31 = vld [vmem:[%s1748_s3 + $0x38] sm:$0xff]  ;;  %s571_s19 = sand.u32 1, %s1296_s28   ;;  %s1754_s27 = sld [smem:[#allocation17_spill]] }
  0x24   : > { %v1488_v13 = vpack.c.bf16 %v1484_v12, %v1484_v12  ;;  %v1215_v17 = vld [vmem:[%s1751_s21] ss:$0 sm:$0xff]  ;;  %v750_v33 = vpack.c.bf16 %v1154_v31, %v1153_v30  ;;  %v1152_v35 = vld [vmem:[%s1748_s3 + $0x28] sm:$0xff]  ;;  %v1147_v41 = vld [vmem:[%s1747_s26 + $0x30] sm:$0xff]  ;;  %s1137_s20 = sshll.u32 %s571_s19, 3 }
  0x25   : > { %v635_v27 = vld [vmem:[%s1707_s5] sm:$0xff]  ;;  %651 = vmatpush.bf16.msra.mxu2 %v640_v28  ;;  %v1148_v42 = vld [vmem:[%s1747_s26 + $0x38] sm:$0xff]  ;;  %v1146_v45 = vld [vmem:[%s1747_s26 + $0x28] sm:$0xff] }
  0x26   : > { %606 = vmatpush.bf16.msra.mxu0 %v589_v10  ;;  %v639_v32 = vpack.c.bf16 %v636_v29, %v635_v27  ;;  %v1151_v34 = vld [vmem:[%s1748_s3 + $0x20] sm:$0xff]  ;;  %v725_v43 = vpack.c.bf16 %v1148_v42, %v1147_v41  ;;  %v1159_v2 = vld [vmem:[%s1707_s5 + $0x30] sm:$0xff]  ;;  %v1160_v3 = vld [vmem:[%s1707_s5 + $0x38] sm:$0xff]  ;;  %s573_s3 = scalar_lea.vmem [#allocation2], %s1137_s20  ;;  %s1262_s20 = scalar_lea.hbm %s1720_s18, 16 }
  0x27   : > { %629 = vmatpush.bf16.msra.mxu1 %v616_v11  ;;  %v749_v36 = vpack.c.bf16 %v1152_v35, %v1151_v34  ;;  %v1145_v44 = vld [vmem:[%s1747_s26 + $0x20] sm:$0xff]  ;;  %v775_v5 = vpack.c.bf16 %v1160_v3, %v1159_v2  ;;  %v1158_v6 = vld [vmem:[%s1707_s5 + $0x28] sm:$0xff]  ;;  %v934_v3 = vld [vmem:[%s1713_s11 + $0x10] sm:$0xff]  ;;  %s1047_s0 = sshll.u32 %s573_s3, 4  ;;  %s1048_s0 = int_to_ptr.vmem [resolvable:$true] %s1047_s0 }
  0x28   : > { %v724_v46 = vpack.c.bf16 %v1146_v45, %v1145_v44  ;;  %v1217_v47 = vld [vmem:[%s1708_s6] ss:$0 sm:$0xff]  ;;  %v1218_v57 = vld [vmem:[%s1750_s4 + $0x1] ss:$0 sm:$0xff]  ;;  %s1049_s4 = sshll.u32 %s1045_s25, 4  ;;  %s1050_s4 = int_to_ptr.hbm [resolvable:$true] %s1049_s4 }
  0x29   : > { %1140 = vmatmul.msk.bf16.vlgmr.msra.gmra.mxu0 %vm595_vm0, %v1488_v13  ;;  %652 = vmatpush.bf16.msra.mxu2 %v639_v32  ;;  %v1157_v4 = vld [vmem:[%s1707_s5 + $0x20] sm:$0xff]  ;;  %s1256_s1 = sshra.s32 %s1050_s4, 4  ;;  %s1257_s1 = int_to_ptr.hbm [resolvable:$true] %s1256_s1 }
  0x2a   : > { %1141 = vmatmul.msk.bf16.vlgmr.msra.gmra.mxu1 %vm595_vm0, %v1488_v13  ;;  %v774_v7 = vpack.c.bf16 %v1158_v6, %v1157_v4  ;;  %v935_v4 = vld [vmem:[%s1713_s11 + $0x18] sm:$0xff]  ;;  %v932_v6 = vld [vmem:[%s1713_s11] sm:$0xff]  ;;  %s1258_s22 = scalar_lea.hbm %s1257_s1, 8  ;;  %p1263_p0 = scmp.lt.s32.totalorder %s1257_s1, %s1720_s18 }
  0x2b   : > { %737 = vmatpush.bf16.msrb.mxu1 %v725_v43  ;;  %p1259_p11 = scmp.ne.s32.totalorder %s1257_s1, %s1258_s22  ;;  %p1264_p1 = scmp.lt.s32.totalorder %s1262_s20, %s1258_s22 }
  0x2c   : > { %1142 = vmatmul.msk.bf16.vlgmr.msra.gmra.mxu2 %vm595_vm0, %v1488_v13 }
  0x2d   : > { %762 = vmatpush.bf16.msrb.mxu2 %v750_v33  ;;  %p1260_p12 = pnand %p1259_p11, %p1440_p5  ;;  %p1265_p2 = por %p1264_p1, %p1263_p0 }
  0x2f   : > { %738 = vmatpush.bf16.msrb.mxu1 %v724_v46  ;;  %p1261_p13 = pneg %p1260_p12 }
  0x31   : > { %763 = vmatpush.bf16.msrb.mxu2 %v749_v36  ;;  %p1266_p3 = pnand %p1265_p2, %p1261_p13 }
  0x3a   : > { %1150 = vmatmul.msk.bf16.vlgmr.msrb.gmra.mxu1 %vm595_vm0, %v1488_v13 }
  0x3c   : > { %1156 = vmatmul.msk.bf16.vlgmr.msrb.gmra.mxu2 %vm595_vm0, %v1488_v13 }
  0xa6   : > { %v608_v15 = vpop.f32.mrf.mxu0 }
  0xa7   : > { %v631_v16 = vpop.f32.mrf.mxu1  ;;  %v609_v20 = vadd.f32 %v1215_v17, %v608_v15  ;;  %v716_v17 = vld [vmem:[%s1709_s7] sm:$0xff] }
  0xa8   : > { %v632_v18 = vadd.f32 %v1216_v14, %v631_v16  ;;  %v1219_v14 = vld [vmem:[%s1751_s21 + $0x1] ss:$0 sm:$0xff] }
  0xa9   : > { %v658_v24 = vpack.c.bf16 %v609_v20, %v609_v20 }
  0xaa   : > { %v659_v19 = vpack.c.bf16 %v632_v18, %v632_v18 }
  0xac   : > { %v665_v21 = vsel %vm660_vm1, %v659_v19, 0  ;;  %v1220_v19 = vld [vmem:[%s1708_s6 + $0x1] ss:$0 sm:$0xff] }
  0xad   : > { %674 = vmatpush.bf16.xpose.msra.mxu3 %v665_v21 }
  0xae   : > { %v610_v22 = vpop.f32.mrf.mxu0 }
  0xaf   : > { %v633_v23 = vpop.f32.mrf.mxu1  ;;  %v654_v48 = vpop.f32.mrf.mxu2 }
  0xb0   : > { %v655_v49 = vadd.f32 %v1217_v47, %v654_v48 }
  0xb2   : > { %v694_v52 = vpack.c.bf16 %v655_v49, %v655_v49  ;;  %v1221_v49 = vld [vmem:[%s1710_s8] ss:$0 sm:$0xff] }
  0xb4   : > { %1143 = vmatmul.msk.bf16.vlgmr.msra.gmra.mxu3 %vm660_vm1, %v658_v24  ;;  %v700_v54 = vsel %vm698_vm3, %v694_v52, 0 }
  0xb5   : > { %709 = vmatpush.bf16.msrb.mxu0 %v700_v54  ;;  %787 = vmatpush.bf16.msrb.mxu3 %v775_v5  ;;  %v937_v5 = vpack.c.bf16 %v935_v4, %v934_v3 }
  0xb7   : > { %v656_v55 = vpop.f32.mrf.mxu2  ;;  %v740_v0 = vpop.f32.mrf.mxu1 }
  0xb8   : > { %v741_v15 = vadd.f32 %v1219_v14, %v740_v0 }
  0xb9   : > { %788 = vmatpush.bf16.msrb.mxu3 %v774_v7  ;;  %v933_v7 = vld [vmem:[%s1713_s11 + $0x8] sm:$0xff] }
  0xba   : > { %v794_v16 = vpack.c.bf16 %v741_v15, %v741_v15 }
  0xbf   : > { %v765_v59 = vpop.f32.mrf.mxu2  ;;  %v742_v1 = vpop.f32.mrf.mxu1 }
  0xc0   : > { %v766_v60 = vadd.f32 %v1218_v57, %v765_v59 }
  0xc2   : > { %v795_v61 = vpack.c.bf16 %v766_v60, %v766_v60 }
  0xc4   : > { %v800_v62 = vsel %vm660_vm1, %v795_v61, 0  ;;  %1162 = vmatmul.msk.bf16.vlgmr.msrb.gmra.mxu3 %vm595_vm0, %v1488_v13  ;;  %v717_v13 = vld [vmem:[%s1709_s7 + $0x8] sm:$0xff] }
  0xc5   : > { %809 = vmatpush.bf16.xpose.msra.mxu0 %v800_v62  ;;  %v718_v18 = vpack.c.bf16 %v717_v13, %v716_v17 }
  0xc7   : > { %v767_v63 = vpop.f32.mrf.mxu2  ;;  %879 = vmatpush.bf16.msra.mxu3 %v718_v18 }
 0x137   : > { %v676_v37 = vpop.f32.mrf.mxu3 }
 0x138   : > { %v680_v38 = vmul.f32 0.25, %v676_v37 }
 0x13a   : > { %v682_v39 = vsel %vm681_vm2, %v680_v38, -inf }
 0x13b   : > { %683 = vmax.xlane.f32.xlu0 %v682_v39  ;;  %v1165_v39 = vld [vmem:[%s1709_s7 + $0x10] sm:$0xff] }
 0x13f   : > { %v678_v40 = vpop.f32.mrf.mxu3 }
 0x140   : > { %v1166_v40 = vld [vmem:[%s1709_s7 + $0x18] sm:$0xff] }
 0x141   : > { %v852_v41 = vpack.c.bf16 %v1166_v40, %v1165_v39 }
 0x143   : > { %863 = vmatpush.bf16.msra.mxu2 %v852_v41 }
 0x147   : > { %v790_v21 = vpop.f32.mrf.mxu3 }
 0x148   : > { %v791_v23 = vadd.f32 %v1220_v19, %v790_v21  ;;  %v962_v19 = vld [vmem:[%s1715_s13 + $0x10] sm:$0xff] }
 0x14a   : > { %v828_v24 = vpack.c.bf16 %v791_v23, %v791_v23 }
 0x14c   : > { %v833_v25 = vsel %vm698_vm3, %v828_v24, 0 }
 0x14d   : > { %842 = vmatpush.bf16.msra.mxu1 %v833_v25 }
 0x14f   : > { %v792_v27 = vpop.f32.mrf.mxu3 }
 0x1ae   : > { %v684_v50 = vpop.xlane.xlu0 %683 }
 0x1af   : > { %v685_v51 = vsub.f32 %v680_v38, %v684_v50 }
 0x1b1   : > { %v686_v53 = vmul.f32 1.442695, %v685_v51 }
 0x1b3   : > { %1228 = vpow2.f32 %v686_v53 }
 0x1b9   : > { %v1229_v56 = vpop.eup %1228 }
 0x1ba   : > { %v688_v58 = vsel %vm681_vm2, %v1229_v56, 0.0 }
 0x1bb   : > { %689 = vadd.xlane.f32.xlu0 %v688_v58 }
 0x22e   : > { %v690_v8 = vpop.xlane.xlu0 %689 }
 0x22f   : > { %1230 = vrcp.f32 %v690_v8  ;;  %v936_v8 = vpack.c.bf16 %v933_v7, %v932_v6 }
 0x235   : > { %v1231_v9 = vpop.eup %1230 }
 0x236   : > { %v692_v10 = vmul.f32 %v1231_v9, %v1229_v56  ;;  %v1306_v56 = vmov 32.0   ;;  %v966_v9 = vld [vmem:[%s1715_s13 + $0x30] sm:$0xff] }
 0x238   : > { %v693_v11 = vpack.c.bf16 %v692_v10, %v692_v10  ;;  %v967_v10 = vld [vmem:[%s1715_s13 + $0x38] sm:$0xff] }
 0x239   : > { %v971_v15 = vpack.c.bf16 %v967_v10, %v966_v9 }
 0x23a   : > { %1144 = vmatmul.msk.bf16.vlgmr.msrb.gmra.mxu0 %vm681_vm2, %v693_v11  ;;  %v964_v11 = vld [vmem:[%s1715_s13 + $0x20] sm:$0xff] }
 0x23b   : > { %951 = vmatpush.bf16.msrb.mxu0 %v937_v5  ;;  %984 = vmatpush.bf16.msrb.mxu1 %v971_v15 }
 0x23f   : > { %952 = vmatpush.bf16.msrb.mxu0 %v936_v8 }
 0x24a   : > { %1163 = vmatmul.msk.bf16.vlgmr.msra.gmra.mxu0 %vm660_vm1, %v794_v16  ;;  %v965_v16 = vld [vmem:[%s1715_s13 + $0x28] sm:$0xff] }
 0x24b   : > { %v970_v13 = vpack.c.bf16 %v965_v16, %v964_v11 }
 0x24d   : > { %985 = vmatpush.bf16.msrb.mxu1 %v970_v13 }
 0x2b7   : > { %v711_v20 = vpop.f32.mrf.mxu0 }
 0x2b8   : > { %v715_v22 = vpack.c.bf16 %v711_v20, %v711_v20  ;;  %v963_v20 = vld [vmem:[%s1715_s13 + $0x18] sm:$0xff] }
 0x2b9   : > { %v969_v21 = vpack.c.bf16 %v963_v20, %v962_v19 }
 0x2ba   : > { %1168 = vmatmul.msk.bf16.vlgmr.msra.gmra.mxu3 %vm660_vm1, %v715_v22 }
 0x2bb   : > { %986 = vmatpush.bf16.msrb.mxu1 %v969_v21 }
 0x2bf   : > { %v713_v26 = vpop.f32.mrf.mxu0 }
 0x2c7   : > { %v811_v28 = vpop.f32.mrf.mxu0 }
 0x2c8   : > { %v815_v29 = vmul.f32 0.25, %v811_v28  ;;  %v1222_v28 = vld [vmem:[%s1711_s9] ss:$0 sm:$0xff] }
 0x2ca   : > { %v816_v30 = vsel %vm681_vm2, %v815_v29, -inf }
 0x2cb   : > { %817 = vmax.xlane.f32.xlu1 %v816_v30  ;;  %v1223_v30 = vld [vmem:[%s1712_s10] ss:$0 sm:$0xff] }
 0x2cf   : > { %v813_v31 = vpop.f32.mrf.mxu0 }
 0x33d   : > { %v881_v32 = vpop.f32.mrf.mxu3 }
 0x33e   : > { %v818_v33 = vpop.xlane.xlu1 %817 }
 0x33f   : > { %v819_v34 = vsub.f32 %v815_v29, %v818_v33 }
 0x341   : > { %v820_v35 = vmul.f32 1.442695, %v819_v34 }
 0x343   : > { %1232 = vpow2.f32 %v820_v35  ;;  %v960_v35 = vld [vmem:[%s1715_s13] sm:$0xff] }
 0x345   : > { %v883_v36 = vpop.f32.mrf.mxu3 }
 0x346   : > { %v961_v36 = vld [vmem:[%s1715_s13 + $0x8] sm:$0xff] }
 0x349   : > { %v1233_v37 = vpop.eup %1232 }
 0x34a   : > { %v822_v38 = vsel %vm681_vm2, %v1233_v37, 0.0 }
 0x34b   : > { %823 = vadd.xlane.f32.xlu1 %v822_v38  ;;  %v1224_v38 = vld [vmem:[%s1714_s12] ss:$0 sm:$0xff] }
 0x3be   : > { %v824_v42 = vpop.xlane.xlu1 %823 }
 0x3bf   : > { %1234 = vrcp.f32 %v824_v42 }
 0x3c0   : > { %1236 = vrcp.f32 %v1306_v56 }
 0x3c5   : > { %v1235_v43 = vpop.eup %1234 }
 0x3c6   : > { %v826_v44 = vmul.f32 %v1235_v43, %v1233_v37  ;;  %v1237_v57 = vpop.eup %1236  ;;  %v968_v37 = vpack.c.bf16 %v961_v36, %v960_v35 }
 0x3c7   : > { %v897_v58 = vmul.f32 32.0, %v1237_v57  ;;  %vm901_vm4 = vweird.f32 %v1237_v57 }
 0x3c8   : > { %v827_v45 = vpack.c.bf16 %v826_v44, %v826_v44  ;;  %987 = vmatpush.bf16.msrb.mxu1 %v968_v37  ;;  %v1225_v44 = vld [vmem:[%s1716_s14] ss:$0 sm:$0xff] }
 0x3c9   : > { %v898_v59 = vsub.f32 1.0, %v897_v58 }
 0x3ca   : > { %1164 = vmatmul.msk.bf16.vlgmr.msra.gmra.mxu1 %vm681_vm2, %v827_v45 }
 0x3cb   : > { %v899_v60 = vmul.f32 %v1237_v57, %v898_v59 }
 0x3cd   : > { %v900_v61 = vadd.f32 %v1237_v57, %v899_v60 }
 0x3cf   : > { %v1599_v62 = vsel %vm901_vm4, %v1237_v57, %v900_v61 }
 0x447   : > { %v844_v46 = vpop.f32.mrf.mxu1 }
 0x448   : > { %v848_v47 = vpack.c.bf16 %v844_v46, %v844_v46 }
 0x44a   : > { %1167 = vmatmul.msk.bf16.vlgmr.msra.gmra.mxu2 %vm660_vm1, %v848_v47 }
 0x44f   : > { %v846_v48 = vpop.f32.mrf.mxu1 }
 0x4cd   : > { %v865_v50 = vpop.f32.mrf.mxu2 }
 0x4ce   : > { %v882_v51 = vadd.f32 %v881_v32, %v865_v50 }
 0x4d0   : > { %v889_v52 = vadd.f32 %v1221_v49, %v882_v51 }
 0x4d2   : > { %v890_v53 = vadd.f32 %v889_v52, %v1484_v12 }
 0x4d4   : > { %v893_v54 = vsel %vm595_vm0, %v890_v53, 0.0 }
 0x4d5   : > { %894 = vadd.xlane.f32.xlu2 %v893_v54  ;;  %v867_v55 = vpop.f32.mrf.mxu2 }
 0x548   : > { %v895_v63 = vpop.xlane.xlu2 %894 }
 0x549   : > { %v903_v0 = vmul.f32 %v1599_v62, %v895_v63 }
 0x54b   : > { %v904_v1 = vsub.f32 %v890_v53, %v903_v0 }
 0x54d   : > { %v905_v2 = vmul.f32 %v904_v1, %v904_v1 }
 0x54f   : > { %v906_v12 = vsel %vm595_vm0, %v905_v2, 0.0 }
 0x550   : > { %907 = vadd.xlane.f32.xlu2 %v906_v12  ;;  %v1227_v12 = vld [vmem:[%s1754_s27] ss:$0 sm:$0xff] }
 0x5c3   : > { %v908_v14 = vpop.xlane.xlu2 %907 }
 0x5c4   : > { %v909_v17 = vmul.f32 %v908_v14, %v1599_v62 }
 0x5c6   : > { %v910_v18 = vadd.f32 1e-06, %v909_v17 }
 0x5c8   : > { %1238 = vrsqrt.f32 %v910_v18  ;;  %vm917_vm6 = vweird.f32 %v910_v18 }
 0x5ce   : > { %v1239_v22 = vpop.eup %1238 }
 0x5cf   : > { %v912_v23 = vmul.f32 %v1239_v22, %v910_v18  ;;  %vm918_vm5 = vweird.f32 %v1239_v22 }
 0x5d0   : > { %vm919_vm7 = vmor %vm917_vm6, %vm918_vm5 }
 0x5d1   : > { %v913_v24 = vmul.f32 %v1239_v22, %v912_v23 }
 0x5d3   : > { %v914_v25 = vmul.f32 0.5, %v913_v24 }
 0x5d5   : > { %v915_v26 = vsub.f32 1.5, %v914_v25 }
 0x5d7   : > { %v916_v27 = vmul.f32 %v1239_v22, %v915_v26 }
 0x5d9   : > { %v920_v29 = vsel %vm919_vm7, %v1239_v22, %v916_v27 }
 0x5da   : > { %v921_v31 = vmul.f32 %v920_v29, %v904_v1  ;;  %v1226_v1 = vld [vmem:[%s1717_s15] ss:$0 sm:$0xff] }
 0x5dc   : > { %v925_v32 = vmul.f32 %v1222_v28, %v921_v31 }
 0x5de   : > { %v929_v33 = vadd.f32 %v1223_v30, %v925_v32 }
 0x5e0   : > { %930 = vst.msk [vmem:[%s581_s29] sm:$0xff] %vm595_vm0, %v929_v33  ;;  %v931_v34 = vpack.c.bf16 %v929_v33, %v929_v33  ;;  %s1032_s29 = scalar_lea.sflag [#allocation3], %s571_s19 }
 0x5e2   : > { %1169 = vmatmul.msk.bf16.vlgmr.msrb.gmra.mxu0 %vm595_vm0, %v931_v34 }
 0x65f   : > { %v954_v39 = vpop.f32.mrf.mxu0 }
 0x660   : > { %v955_v40 = vadd.f32 %v1224_v38, %v954_v39 }
 0x662   : > { %v958_v41 = vmax.f32 %v955_v40, 0.0 }
 0x664   : > { %v959_v42 = vpack.c.bf16 %v958_v41, %v958_v41 }
 0x666   : > { %1170 = vmatmul.msk.bf16.vlgmr.msrb.gmra.mxu1 %vm976_vm8, %v959_v42 }
 0x667   : > { %v956_v43 = vpop.f32.mrf.mxu0 }
 0x6e3   : > { %v989_v45 = vpop.f32.mrf.mxu1 }
 0x6e4   : > { %v990_v46 = vadd.f32 %v1225_v44, %v989_v45 }
 0x6e6   : > { %v993_v47 = vadd.f32 %v990_v46, %v929_v33 }
 0x6e8   : > { %v996_v48 = vsel %vm595_vm0, %v993_v47, 0.0 }
 0x6e9   : > { %997 = vadd.xlane.f32.xlu0 %v996_v48 }
 0x6eb   : > { %v991_v49 = vpop.f32.mrf.mxu1 }
 0x75c   : > { %v998_v50 = vpop.xlane.xlu0 %997 }
 0x75d   : > { %v999_v51 = vmul.f32 %v998_v50, %v1599_v62 }
 0x75f   : > { %v1000_v52 = vsub.f32 %v993_v47, %v999_v51 }
 0x761   : > { %v1001_v53 = vmul.f32 %v1000_v52, %v1000_v52 }
 0x763   : > { %v1002_v54 = vsel %vm595_vm0, %v1001_v53, 0.0 }
 0x764   : > { %1003 = vadd.xlane.f32.xlu1 %v1002_v54 }
 0x7d7   : > { %v1004_v55 = vpop.xlane.xlu1 %1003 }
 0x7d8   : > { %v1005_v56 = vmul.f32 %v1004_v55, %v1599_v62 }
 0x7da   : > { %v1006_v57 = vadd.f32 1e-06, %v1005_v56 }
 0x7dc   : > { %1240 = vrsqrt.f32 %v1006_v57  ;;  %vm1013_vm10 = vweird.f32 %v1006_v57 }
 0x7e2   : > { %v1241_v58 = vpop.eup %1240 }
 0x7e3   : > { %v1008_v59 = vmul.f32 %v1241_v58, %v1006_v57  ;;  %vm1014_vm9 = vweird.f32 %v1241_v58 }
 0x7e4   : > { %vm1015_vm11 = vmor %vm1013_vm10, %vm1014_vm9 }
 0x7e5   : > { %v1009_v60 = vmul.f32 %v1241_v58, %v1008_v59 }
 0x7e7   : > { %v1010_v61 = vmul.f32 0.5, %v1009_v60 }
 0x7e9   : > { %v1011_v63 = vsub.f32 1.5, %v1010_v61 }
 0x7eb   : > { %v1012_v0 = vmul.f32 %v1241_v58, %v1011_v63 }
 0x7ed   : > { %v1016_v62 = vsel %vm1015_vm11, %v1241_v58, %v1012_v0 }
 0x7ee   : > { %v1017_v2 = vmul.f32 %v1016_v62, %v1000_v52 }
 0x7f0   : > { %v1021_v3 = vmul.f32 %v1226_v1, %v1017_v2 }
 0x7f2   : > { %v1025_v4 = vadd.f32 %v1227_v12, %v1021_v3 }
 0x7f4   : > { %1026 = vst.msk [vmem:[%s573_s3] sm:$0xff] %vm595_vm0, %v1025_v4 }
 0x7f5   : > { %1269 = shalt.err (!%p1266_p3)
}
 0x7f6   : > { %1175 = dma.vmem_to_hbm [thread:$0]  (%p1440_p5), %s1048_s0, 128, %s1050_s4, %s1032_s29  }
 0x7f7 PF: > { %s1755_s3 = sld [smem:[#allocation7_spill]] }
 0x7f8   : > { %s1756_s19 = sld [smem:[#allocation5_spill]] }
 0x7fd   : > { %p1181_p4 = scmp.ge.s32.totalorder %s1755_s3, 2 }
 0x7fe   : > { %s1068_s27 = sand.u32 1, %s1756_s19  }
 0x7ff   : > { %p1178_p7 = pnand %p1181_p4, %p1444_p6  ;;  %s1069_s23 = scalar_lea.sflag [#allocation3], %s1068_s27 }
 0x801   : > { %p1179_p8 = pneg %p1178_p7 }
 0x803   : > { %1287 = dma.done.wait (%p1179_p8), %s1069_s23, 128  }
 0x804   : > { %1289 = vsyncadd (%p1179_p8), %s1069_s23, 4294967168  ;;  %s1758_s30 = sld [smem:[#allocation8_spill]]  ;;  %s1761_s27 = smov %s1296_s28 }
 0x805   : > { %s1759_s1 = sld [smem:[#allocation6_spill]] }
 0x806   : > { %s1760_s29 = sld [smem:[#allocation9_spill]] }
 0x80a   : > { %p29_p9 = scmp.ge.s32.totalorder %s1758_s30, 4  }
 0x80b   : > { %s1762_s28 = smov %s1759_s1 }
 0x80c   :  { %31 = sbr.rel (!%p29_p9) target bundleno = 10 (0xa), region = 142 }
 0x811   :  { %1075 = vsyncpa [#allocation3], 1 }
 0x812   :  { %1077 = vsyncpa [#allocation3 + $0x1], 1 }

</bundles_post_ra>
